<compile_context>
chip_gen: v7x
topology: tpu7x:2x2x1
jax: 0.10.0
libtpu: 0.0.40
codegen_flags: <defaults>
</compile_context>

<pallas_src>
import math
import functools

import jax
import jax.numpy as jnp
from jax.experimental import pallas as pl
from jax.experimental.pallas import tpu as pltpu


# ---------------------------------------------------------------------------
# Fused encoder-stack kernel: one grid step = (one batch element, one layer)
# ---------------------------------------------------------------------------
def _encoder_stack_kernel(x_ref, bias_ref,
                          wq_ref, wk_ref, wv_ref, wo_ref,
                          bq_ref, bk_ref, bv_ref, bo_ref,
                          w1_ref, b1_ref, w2_ref, b2_ref,
                          o_ref, x_carry, *, heads):
    """Refs per grid step:
      x_ref    (1, S, D) f32      embeddings+PE (DMA'd once per batch element)
      bias_ref (1, 1, S) f32      additive key mask: 0 = attend, -1e9 = masked
      wq/wk/wv (1, D, D) bf16     per-layer projection weights
      wo_ref   (1, H, dk, D) bf16 output projection pre-split per head
      bq/bk/bv/bo (1, 1, D) f32
      w1 (1, D, F) bf16  b1 (1, 1, F) f32  w2 (1, F, D) bf16  b2 (1, 1, D) f32
      o_ref    (1, S, D) f32      encoder output (written at the last layer)
      x_carry  (S, D)    f32      VMEM scratch carrying x across the layer axis
    """
    layer = pl.program_id(1)
    n_layers = pl.num_programs(1)

    @pl.when(layer == 0)
    def _():
        x_carry[...] = x_ref[0]

    x = x_carry[...]                              # (S, D) f32
    D = x.shape[-1]
    dk = D // heads
    scale = 1.0 / math.sqrt(dk)
    bias = bias_ref[...]                          # (1, 1, S) -> broadcasts over (H, Sq, Sk)

    # ---- multi-head self-attention ----------------------------------------
    xb = x.astype(jnp.bfloat16)                   # bf16 operands, f32 accumulation
    q = jnp.dot(xb, wq_ref[0], preferred_element_type=jnp.float32) + bq_ref[0]
    k = jnp.dot(xb, wk_ref[0], preferred_element_type=jnp.float32) + bk_ref[0]
    v = jnp.dot(xb, wv_ref[0], preferred_element_type=jnp.float32) + bv_ref[0]
    q = q * scale                                 # fold 1/sqrt(dk) into Q (S*D mults)

    # Heads as a leading batch axis: (S, D) -> (H, S, dk), then single batched
    # contractions instead of a per-head matmul loop / explicit K transpose.
    def split_heads(t):
        return jnp.stack([t[:, h * dk:(h + 1) * dk] for h in range(heads)],
                         axis=0).astype(jnp.bfloat16)
    qh, kh, vh = split_heads(q), split_heads(k), split_heads(v)   # (H, S, dk) bf16

    s = jnp.einsum('hqd,hkd->hqk', qh, kh,
                   preferred_element_type=jnp.float32)            # (H, S, S) f32
    s = s + bias                                                  # additive key mask
    s = s - jnp.max(s, axis=-1, keepdims=True)
    p = jnp.exp(s)                                                # unnormalized probs
    inv_l = pl.reciprocal(jnp.sum(p, axis=-1, keepdims=True),
                          approx=True)                            # (H, S, 1) f32

    ctx = jnp.einsum('hqk,hkd->hqd', p.astype(jnp.bfloat16), vh,
                     preferred_element_type=jnp.float32)          # (H, S, dk) f32
    ctx = ctx * inv_l                             # normalize after PV (H*S*dk mults)

    # concat_h(ctx_h) @ Wo  ==  sum_h ctx_h @ Wo[h]   (no lane-axis concat)
    proj = jnp.einsum('hsd,hdf->hsf', ctx.astype(jnp.bfloat16), wo_ref[0],
                      preferred_element_type=jnp.float32)         # (H, S, D)
    attn = jnp.sum(proj, axis=0) + bo_ref[0]                      # (S, D) f32

    # ---- position-wise feed-forward: Linear -> ReLU -> Linear ---------------
    h1 = jnp.dot(attn.astype(jnp.bfloat16), w1_ref[0],
                 preferred_element_type=jnp.float32) + b1_ref[0]
    h1 = jnp.maximum(h1, 0.0)
    out = jnp.dot(h1.astype(jnp.bfloat16), w2_ref[0],
                  preferred_element_type=jnp.float32) + b2_ref[0]

    x_carry[...] = out                            # carry to the next layer

    @pl.when(layer == n_layers - 1)
    def _():
        o_ref[0] = out.astype(o_ref.dtype)


# ---------------------------------------------------------------------------
# pallas_call wrapper
# ---------------------------------------------------------------------------
def encoder_stack_pallas(x, bias, stacked, *, heads):
    B, S, D = x.shape
    L = stacked["wq"].shape[0]
    F = stacked["w1"].shape[-1]
    dk = D // heads

    amap = lambda b, l: (b, 0, 0)        # activations / mask / output: batch only
    wmap3 = lambda b, l: (l, 0, 0)       # stacked per-layer weights
    wmap4 = lambda b, l: (l, 0, 0, 0)

    return pl.pallas_call(
        functools.partial(_encoder_stack_kernel, heads=heads),
        out_shape=jax.ShapeDtypeStruct((B, S, D), x.dtype),
        grid=(B, L),
        in_specs=[
            pl.BlockSpec((1, S, D), amap),            # x
            pl.BlockSpec((1, 1, S), amap),            # additive key-mask bias
            pl.BlockSpec((1, D, D), wmap3),           # wq
            pl.BlockSpec((1, D, D), wmap3),           # wk
            pl.BlockSpec((1, D, D), wmap3),           # wv
            pl.BlockSpec((1, heads, dk, D), wmap4),   # wo (pre-split per head)
            pl.BlockSpec((1, 1, D), wmap3),           # bq
            pl.BlockSpec((1, 1, D), wmap3),           # bk
            pl.BlockSpec((1, 1, D), wmap3),           # bv
            pl.BlockSpec((1, 1, D), wmap3),           # bo
            pl.BlockSpec((1, D, F), wmap3),           # w1
            pl.BlockSpec((1, 1, F), wmap3),           # b1
            pl.BlockSpec((1, F, D), wmap3),           # w2
            pl.BlockSpec((1, 1, D), wmap3),           # b2
        ],
        out_specs=pl.BlockSpec((1, S, D), amap),
        scratch_shapes=[pltpu.VMEM((S, D), jnp.float32)],
        compiler_params=pltpu.CompilerParams(
            dimension_semantics=("parallel", "arbitrary")),
    )(x, bias,
      stacked["wq"], stacked["wk"], stacked["wv"], stacked["wo"],
      stacked["bq"], stacked["bk"], stacked["bv"], stacked["bo"],
      stacked["w1"], stacked["b1"], stacked["w2"], stacked["b2"])


def stack_layer_params(layers, heads):
    """Stack per-layer params to (L, ...) and cast matmul weights to bf16."""
    L = len(layers)
    d_model = layers[0]["wq"].shape[0]
    dk = d_model // heads
    st = lambda name: jnp.stack([lyr[name] for lyr in layers], axis=0)
    return dict(
        wq=st("wq").astype(jnp.bfloat16),
        wk=st("wk").astype(jnp.bfloat16),
        wv=st("wv").astype(jnp.bfloat16),
        wo=st("wo").reshape(L, heads, dk, d_model).astype(jnp.bfloat16),
        bq=st("bq"), bk=st("bk"), bv=st("bv"), bo=st("bo"),
        w1=st("w1").astype(jnp.bfloat16), b1=st("b1"),
        w2=st("w2").astype(jnp.bfloat16), b2=st("b2"),
    )


# ---------------------------------------------------------------------------
# Parameter construction (deterministic, synthetic)
# ---------------------------------------------------------------------------
def make_params(key, vocab_size, pad_idx, max_seq_len, d_model, ff_dim, heads, n_layers):
    keys = jax.random.split(key, 1 + 12 * n_layers)
    scale = 0.1

    emb = scale * jax.random.normal(keys[0], (vocab_size, d_model), jnp.float32)
    emb = emb.at[pad_idx].set(0.0)                 # padding_idx row is zero

    # sinusoidal positional encoding (max_seq_len, d_model)
    pos = jnp.arange(max_seq_len, dtype=jnp.float32)[:, None]
    i2 = jnp.arange(0, d_model, 2, dtype=jnp.float32)[None, :]
    div = jnp.exp(-math.log(10000.0) * i2 / d_model)
    pe = jnp.zeros((max_seq_len, d_model), jnp.float32)
    pe = pe.at[:, 0::2].set(jnp.sin(pos * div))
    pe = pe.at[:, 1::2].set(jnp.cos(pos * div))

    layers = []
    k = 1
    for _ in range(n_layers):
        def nrm(shape):
            nonlocal k
            w = scale * jax.random.normal(keys[k], shape, jnp.float32)
            k += 1
            return w
        layers.append(dict(
            wq=nrm((d_model, d_model)), wk=nrm((d_model, d_model)),
            wv=nrm((d_model, d_model)), wo=nrm((d_model, d_model)),
            bq=nrm((1, d_model)), bk=nrm((1, d_model)),
            bv=nrm((1, d_model)), bo=nrm((1, d_model)),
            w1=nrm((d_model, ff_dim)), b1=nrm((1, ff_dim)),
            w2=nrm((ff_dim, d_model)), b2=nrm((1, d_model)),
        ))
    return dict(emb=emb, pe=pe, layers=layers)


def encoder_forward(params, ids, mask, *, d_model, heads):
    # Embedding + positional encoding (plain-JAX glue).
    x = params["emb"][ids] * math.sqrt(d_model)             # (B, S, D) f32
    S = ids.shape[1]
    x = x + params["pe"][:S][None, :, :]
    # Additive key mask: 0.0 where attend, -1e9 where padded.
    bias = ((mask.astype(jnp.float32) - 1.0) * 1e9)[:, None, :]   # (B, 1, S)
    stacked = stack_layer_params(params["layers"], heads)
    return encoder_stack_pallas(x, bias, stacked, heads=heads)


# ---------------------------------------------------------------------------
# Pure-JAX reference (matmul_dtype lets us mirror the kernel's bf16 operands)
# ---------------------------------------------------------------------------
def encoder_reference(params, ids, mask, *, d_model, heads, matmul_dtype=jnp.float32):
    c = lambda a: a.astype(matmul_dtype)
    x = params["emb"][ids] * math.sqrt(d_model)
    B, S = ids.shape
    x = x + params["pe"][:S][None, :, :]
    dk = d_model // heads
    scale = 1.0 / math.sqrt(dk)
    for layer in params["layers"]:
        q = jnp.einsum("bsd,de->bse", c(x), c(layer["wq"]),
                       preferred_element_type=jnp.float32) + layer["bq"]
        k = jnp.einsum("bsd,de->bse", c(x), c(layer["wk"]),
                       preferred_element_type=jnp.float32) + layer["bk"]
        v = jnp.einsum("bsd,de->bse", c(x), c(layer["wv"]),
                       preferred_element_type=jnp.float32) + layer["bv"]
        qh = q.reshape(B, S, heads, dk).transpose(0, 2, 1, 3)
        kh = k.reshape(B, S, heads, dk).transpose(0, 2, 1, 3)
        vh = v.reshape(B, S, heads, dk).transpose(0, 2, 1, 3)
        s = jnp.einsum("bhqd,bhkd->bhqk", c(qh), c(kh),
                       preferred_element_type=jnp.float32) * scale
        s = jnp.where(mask[:, None, None, :] > 0, s, -1e9)
        p = jax.nn.softmax(s, axis=-1)
        ctx = jnp.einsum("bhqk,bhkd->bhqd", c(p), c(vh),
                         preferred_element_type=jnp.float32)
        ctx = ctx.transpose(0, 2, 1, 3).reshape(B, S, d_model)
        a = jnp.einsum("bsd,de->bse", c(ctx), c(layer["wo"]),
                       preferred_element_type=jnp.float32) + layer["bo"]
        h = jnp.maximum(jnp.einsum("bsd,df->bsf", c(a), c(layer["w1"]),
                                   preferred_element_type=jnp.float32) + layer["b1"], 0.0)
        x = jnp.einsum("bsf,fd->bsd", c(h), c(layer["w2"]),
                       preferred_element_type=jnp.float32) + layer["b2"]
    return x


if __name__ == "__main__":
    B, S = 2, 8
    vocab_size, pad_idx, max_seq_len = 32, 0, 16
    d_model, ff_dim, heads, n_layers = 32, 64, 4, 2

    key = jax.random.PRNGKey(0)
    k_ids, k_params = jax.random.split(key)

    ids = jax.random.randint(k_ids, (B, S), 1, vocab_size, dtype=jnp.int32)
    ids = ids.at[0, -2:].set(pad_idx)                       # some padding tokens
    mask = (ids != pad_idx).astype(jnp.float32)             # (B, S), 1 = attend

    params = make_params(k_params, vocab_size, pad_idx, max_seq_len,
                         d_model, ff_dim, heads, n_layers)

    out = encoder_forward(params, ids, mask, d_model=d_model, heads=heads)
    out = jax.block_until_ready(out)

    assert out.shape == (B, S, d_model)
    assert jnp.all(jnp.isfinite(out))

    # Strict structural check against a reference using the same bf16-operand /
    # f32-accumulate matmul precision as the kernel.
    ref_bf16 = encoder_reference(params, ids, mask, d_model=d_model, heads=heads,
                                 matmul_dtype=jnp.bfloat16)
    assert jnp.allclose(out, ref_bf16, atol=1e-2, rtol=2e-2), "mismatch vs bf16 reference"

    # Loose sanity check against the pure-f32 reference (bf16 rounding only).
    ref_f32 = encoder_reference(params, ids, mask, d_model=d_model, heads=heads,
                                matmul_dtype=jnp.float32)
    assert jnp.allclose(out, ref_f32, atol=5e-2, rtol=5e-2), "mismatch vs f32 reference"

    # TODO(synk): the spec's EncoderLayer.forward references an undefined `x` and
    # has no return; residual connections / LayerNorm sublayers are not defined
    # there, so this implements the intended MHA -> FF pipeline only.
    print("KERNEL_OK")
</pallas_src>

<mosaic_0001>
module attributes {stable_mosaic.version = 11 : i64} {
  func.func @_encoder_stack_kernel(%arg0: i32, %arg1: i32, %arg2: memref<1x8x32xf32, #tpu.memory_space<vmem>>, %arg3: memref<1x1x8xf32, #tpu.memory_space<vmem>>, %arg4: memref<1x32x32xbf16, #tpu.memory_space<vmem>>, %arg5: memref<1x32x32xbf16, #tpu.memory_space<vmem>>, %arg6: memref<1x32x32xbf16, #tpu.memory_space<vmem>>, %arg7: memref<1x4x8x32xbf16, #tpu.memory_space<vmem>>, %arg8: memref<1x1x32xf32, #tpu.memory_space<vmem>>, %arg9: memref<1x1x32xf32, #tpu.memory_space<vmem>>, %arg10: memref<1x1x32xf32, #tpu.memory_space<vmem>>, %arg11: memref<1x1x32xf32, #tpu.memory_space<vmem>>, %arg12: memref<1x32x64xbf16, #tpu.memory_space<vmem>>, %arg13: memref<1x1x64xf32, #tpu.memory_space<vmem>>, %arg14: memref<1x64x32xbf16, #tpu.memory_space<vmem>>, %arg15: memref<1x1x32xf32, #tpu.memory_space<vmem>>, %arg16: memref<1x8x32xf32, #tpu.memory_space<vmem>>, %arg17: memref<8x32xf32, #tpu.memory_space<vmem>>) attributes {dimension_semantics = [#tpu.dimension_semantics<parallel>, #tpu.dimension_semantics<arbitrary>], iteration_bounds = array<i64: 2, 2>, scalar_prefetch = 0 : i64, scratch_operands = 1 : i64, tpu.core_type = #tpu.core_type<tc>, window_params = [{transform_indices = @transform_0, window_bounds = array<i64: 1, 8, 32>}, {transform_indices = @transform_1, window_bounds = array<i64: 1, 1, 8>}, {transform_indices = @transform_2, window_bounds = array<i64: 1, 32, 32>}, {transform_indices = @transform_3, window_bounds = array<i64: 1, 32, 32>}, {transform_indices = @transform_4, window_bounds = array<i64: 1, 32, 32>}, {transform_indices = @transform_5, window_bounds = array<i64: 1, 4, 8, 32>}, {transform_indices = @transform_6, window_bounds = array<i64: 1, 1, 32>}, {transform_indices = @transform_7, window_bounds = array<i64: 1, 1, 32>}, {transform_indices = @transform_8, window_bounds = array<i64: 1, 1, 32>}, {transform_indices = @transform_9, window_bounds = array<i64: 1, 1, 32>}, {transform_indices = @transform_10, window_bounds = array<i64: 1, 32, 64>}, {transform_indices = @transform_11, window_bounds = array<i64: 1, 1, 64>}, {transform_indices = @transform_12, window_bounds = array<i64: 1, 64, 32>}, {transform_indices = @transform_13, window_bounds = array<i64: 1, 1, 32>}, {transform_indices = @transform_14, window_bounds = array<i64: 1, 8, 32>}]} {
    %c0_i32 = arith.constant 0 : i32
    %0 = arith.cmpi eq, %arg1, %c0_i32 : i32
    %1 = arith.extui %0 : i1 to i32
    %c0_i32_0 = arith.constant 0 : i32
    %2 = arith.cmpi ne, %1, %c0_i32_0 : i32
    scf.if %2 {
      %c0_57 = arith.constant 0 : index
      %c0_58 = arith.constant 0 : index
      %c0_59 = arith.constant 0 : index
      %105 = vector.load %arg2[%c0_57, %c0_58, %c0_59] : memref<1x8x32xf32, #tpu.memory_space<vmem>>, vector<1x8x32xf32>
      %106 = vector.shape_cast %105 : vector<1x8x32xf32> to vector<8x32xf32>
      %c0_60 = arith.constant 0 : index
      %c0_61 = arith.constant 0 : index
      %107 = vector.load %arg17[%c0_60, %c0_61] : memref<8x32xf32, #tpu.memory_space<vmem>>, vector<8x32xf32>
      tpu.vector_store %arg17[%c0_60, %c0_61], %106 {strides = array<i32>} : memref<8x32xf32, #tpu.memory_space<vmem>>, vector<8x32xf32>,
    } else {
    }
    %c0 = arith.constant 0 : index
    %c0_1 = arith.constant 0 : index
    %3 = vector.load %arg17[%c0, %c0_1] : memref<8x32xf32, #tpu.memory_space<vmem>>, vector<8x32xf32>
    %c0_2 = arith.constant 0 : index
    %c0_3 = arith.constant 0 : index
    %c0_4 = arith.constant 0 : index
    %4 = vector.load %arg3[%c0_2, %c0_3, %c0_4] : memref<1x1x8xf32, #tpu.memory_space<vmem>>, vector<1x1x8xf32>
    %5 = arith.truncf %3 : vector<8x32xf32> to vector<8x32xbf16>
    %c0_5 = arith.constant 0 : index
    %c0_6 = arith.constant 0 : index
    %c0_7 = arith.constant 0 : index
    %6 = vector.load %arg4[%c0_5, %c0_6, %c0_7] : memref<1x32x32xbf16, #tpu.memory_space<vmem>>, vector<1x32x32xbf16>
    %7 = vector.shape_cast %6 : vector<1x32x32xbf16> to vector<32x32xbf16>
    %cst = arith.constant dense<0.000000e+00> : vector<8x32xf32>
    %8 = tpu.matmul %5, %7, %cst {dimension_numbers = #tpu.dot_dimension_numbers<[1], [0], [0], [1], [0, 0, 1, 1], [], []>} : vector<8x32xbf16>, vector<32x32xbf16>, vector<8x32xf32> -> vector<8x32xf32>
    %c0_8 = arith.constant 0 : index
    %c0_9 = arith.constant 0 : index
    %c0_10 = arith.constant 0 : index
    %9 = vector.load %arg8[%c0_8, %c0_9, %c0_10] : memref<1x1x32xf32, #tpu.memory_space<vmem>>, vector<1x1x32xf32>
    %10 = vector.shape_cast %9 : vector<1x1x32xf32> to vector<1x32xf32>
    %11 = vector.broadcast %10 : vector<1x32xf32> to vector<8x32xf32>
    %12 = arith.addf %8, %11 : vector<8x32xf32>
    %c0_11 = arith.constant 0 : index
    %c0_12 = arith.constant 0 : index
    %c0_13 = arith.constant 0 : index
    %13 = vector.load %arg5[%c0_11, %c0_12, %c0_13] : memref<1x32x32xbf16, #tpu.memory_space<vmem>>, vector<1x32x32xbf16>
    %14 = vector.shape_cast %13 : vector<1x32x32xbf16> to vector<32x32xbf16>
    %cst_14 = arith.constant dense<0.000000e+00> : vector<8x32xf32>
    %15 = tpu.matmul %5, %14, %cst_14 {dimension_numbers = #tpu.dot_dimension_numbers<[1], [0], [0], [1], [0, 0, 1, 1], [], []>} : vector<8x32xbf16>, vector<32x32xbf16>, vector<8x32xf32> -> vector<8x32xf32>
    %c0_15 = arith.constant 0 : index
    %c0_16 = arith.constant 0 : index
    %c0_17 = arith.constant 0 : index
    %16 = vector.load %arg9[%c0_15, %c0_16, %c0_17] : memref<1x1x32xf32, #tpu.memory_space<vmem>>, vector<1x1x32xf32>
    %17 = vector.shape_cast %16 : vector<1x1x32xf32> to vector<1x32xf32>
    %18 = vector.broadcast %17 : vector<1x32xf32> to vector<8x32xf32>
    %19 = arith.addf %15, %18 : vector<8x32xf32>
    %c0_18 = arith.constant 0 : index
    %c0_19 = arith.constant 0 : index
    %c0_20 = arith.constant 0 : index
    %20 = vector.load %arg6[%c0_18, %c0_19, %c0_20] : memref<1x32x32xbf16, #tpu.memory_space<vmem>>, vector<1x32x32xbf16>
    %21 = vector.shape_cast %20 : vector<1x32x32xbf16> to vector<32x32xbf16>
    %cst_21 = arith.constant dense<0.000000e+00> : vector<8x32xf32>
    %22 = tpu.matmul %5, %21, %cst_21 {dimension_numbers = #tpu.dot_dimension_numbers<[1], [0], [0], [1], [0, 0, 1, 1], [], []>} : vector<8x32xbf16>, vector<32x32xbf16>, vector<8x32xf32> -> vector<8x32xf32>
    %c0_22 = arith.constant 0 : index
    %c0_23 = arith.constant 0 : index
    %c0_24 = arith.constant 0 : index
    %23 = vector.load %arg10[%c0_22, %c0_23, %c0_24] : memref<1x1x32xf32, #tpu.memory_space<vmem>>, vector<1x1x32xf32>
    %24 = vector.shape_cast %23 : vector<1x1x32xf32> to vector<1x32xf32>
    %25 = vector.broadcast %24 : vector<1x32xf32> to vector<8x32xf32>
    %26 = arith.addf %22, %25 : vector<8x32xf32>
    %cst_25 = arith.constant 0.353553385 : f32
    %27 = vector.broadcast %cst_25 : f32 to vector<8x32xf32>
    %28 = arith.mulf %12, %27 : vector<8x32xf32>
    %29 = vector.extract_strided_slice %28 {offsets = [0, 0], sizes = [8, 8], strides = [1, 1]} : vector<8x32xf32> to vector<8x8xf32>
    %30 = vector.extract_strided_slice %28 {offsets = [0, 8], sizes = [8, 8], strides = [1, 1]} : vector<8x32xf32> to vector<8x8xf32>
    %31 = vector.extract_strided_slice %28 {offsets = [0, 16], sizes = [8, 8], strides = [1, 1]} : vector<8x32xf32> to vector<8x8xf32>
    %32 = vector.extract_strided_slice %28 {offsets = [0, 24], sizes = [8, 8], strides = [1, 1]} : vector<8x32xf32> to vector<8x8xf32>
    %33 = vector.shape_cast %29 : vector<8x8xf32> to vector<1x8x8xf32>
    %34 = vector.shape_cast %30 : vector<8x8xf32> to vector<1x8x8xf32>
    %35 = vector.shape_cast %31 : vector<8x8xf32> to vector<1x8x8xf32>
    %36 = vector.shape_cast %32 : vector<8x8xf32> to vector<1x8x8xf32>
    %37 = tpu.concatenate %33, %34, %35, %36 in 0 : vector<1x8x8xf32>, vector<1x8x8xf32>, vector<1x8x8xf32>, vector<1x8x8xf32> -> vector<4x8x8xf32>
    %38 = arith.truncf %37 : vector<4x8x8xf32> to vector<4x8x8xbf16>
    %39 = vector.extract_strided_slice %19 {offsets = [0, 0], sizes = [8, 8], strides = [1, 1]} : vector<8x32xf32> to vector<8x8xf32>
    %40 = vector.extract_strided_slice %19 {offsets = [0, 8], sizes = [8, 8], strides = [1, 1]} : vector<8x32xf32> to vector<8x8xf32>
    %41 = vector.extract_strided_slice %19 {offsets = [0, 16], sizes = [8, 8], strides = [1, 1]} : vector<8x32xf32> to vector<8x8xf32>
    %42 = vector.extract_strided_slice %19 {offsets = [0, 24], sizes = [8, 8], strides = [1, 1]} : vector<8x32xf32> to vector<8x8xf32>
    %43 = vector.shape_cast %39 : vector<8x8xf32> to vector<1x8x8xf32>
    %44 = vector.shape_cast %40 : vector<8x8xf32> to vector<1x8x8xf32>
    %45 = vector.shape_cast %41 : vector<8x8xf32> to vector<1x8x8xf32>
    %46 = vector.shape_cast %42 : vector<8x8xf32> to vector<1x8x8xf32>
    %47 = tpu.concatenate %43, %44, %45, %46 in 0 : vector<1x8x8xf32>, vector<1x8x8xf32>, vector<1x8x8xf32>, vector<1x8x8xf32> -> vector<4x8x8xf32>
    %48 = arith.truncf %47 : vector<4x8x8xf32> to vector<4x8x8xbf16>
    %49 = vector.extract_strided_slice %26 {offsets = [0, 0], sizes = [8, 8], strides = [1, 1]} : vector<8x32xf32> to vector<8x8xf32>
    %50 = vector.extract_strided_slice %26 {offsets = [0, 8], sizes = [8, 8], strides = [1, 1]} : vector<8x32xf32> to vector<8x8xf32>
    %51 = vector.extract_strided_slice %26 {offsets = [0, 16], sizes = [8, 8], strides = [1, 1]} : vector<8x32xf32> to vector<8x8xf32>
    %52 = vector.extract_strided_slice %26 {offsets = [0, 24], sizes = [8, 8], strides = [1, 1]} : vector<8x32xf32> to vector<8x8xf32>
    %53 = vector.shape_cast %49 : vector<8x8xf32> to vector<1x8x8xf32>
    %54 = vector.shape_cast %50 : vector<8x8xf32> to vector<1x8x8xf32>
    %55 = vector.shape_cast %51 : vector<8x8xf32> to vector<1x8x8xf32>
    %56 = vector.shape_cast %52 : vector<8x8xf32> to vector<1x8x8xf32>
    %57 = tpu.concatenate %53, %54, %55, %56 in 0 : vector<1x8x8xf32>, vector<1x8x8xf32>, vector<1x8x8xf32>, vector<1x8x8xf32> -> vector<4x8x8xf32>
    %58 = arith.truncf %57 : vector<4x8x8xf32> to vector<4x8x8xbf16>
    "tpu.trace_start"() <{level = 10 : i32, message = "hqd,hkd->hqk"}> : () -> ()
    %cst_26 = arith.constant dense<0.000000e+00> : vector<4x8x8xf32>
    %59 = tpu.matmul %38, %48, %cst_26 {dimension_numbers = #tpu.dot_dimension_numbers<[2], [2], [1], [1], [0, 0, 0, 1, 1, 1], [0], [0]>} : vector<4x8x8xbf16>, vector<4x8x8xbf16>, vector<4x8x8xf32> -> vector<4x8x8xf32>
    "tpu.trace_stop"() : () -> ()
    %60 = vector.broadcast %4 : vector<1x1x8xf32> to vector<4x8x8xf32>
    %61 = arith.addf %59, %60 : vector<4x8x8xf32>
    %cst_27 = arith.constant dense<0xFF800000> : vector<4x8xf32>
    %62 = vector.multi_reduction <maximumf>, %61, %cst_27 [2] : vector<4x8x8xf32> to vector<4x8xf32>
    %63 = vector.shape_cast %62 : vector<4x8xf32> to vector<4x8x1xf32>
    %64 = vector.broadcast %63 : vector<4x8x1xf32> to vector<4x8x8xf32>
    %65 = arith.subf %61, %64 : vector<4x8x8xf32>
    %66 = math.exp %65 : vector<4x8x8xf32>
    %cst_28 = arith.constant dense<0.000000e+00> : vector<4x8xf32>
    %67 = vector.multi_reduction <add>, %66, %cst_28 [2] : vector<4x8x8xf32> to vector<4x8xf32>
    %68 = vector.shape_cast %67 : vector<4x8xf32> to vector<4x8x1xf32>
    %69 = tpu.reciprocal %68 {approx = true} : vector<4x8x1xf32> -> vector<4x8x1xf32>
    %70 = arith.truncf %66 : vector<4x8x8xf32> to vector<4x8x8xbf16>
    "tpu.trace_start"() <{level = 10 : i32, message = "hqk,hkd->hqd"}> : () -> ()
    %cst_29 = arith.constant dense<0.000000e+00> : vector<4x8x8xf32>
    %71 = tpu.matmul %70, %58, %cst_29 {dimension_numbers = #tpu.dot_dimension_numbers<[2], [1], [1], [2], [0, 0, 0, 1, 1, 2], [0], [0]>} : vector<4x8x8xbf16>, vector<4x8x8xbf16>, vector<4x8x8xf32> -> vector<4x8x8xf32>
    "tpu.trace_stop"() : () -> ()
    %72 = vector.broadcast %69 : vector<4x8x1xf32> to vector<4x8x8xf32>
    %73 = arith.mulf %71, %72 : vector<4x8x8xf32>
    %74 = arith.truncf %73 : vector<4x8x8xf32> to vector<4x8x8xbf16>
    %c0_30 = arith.constant 0 : index
    %c0_31 = arith.constant 0 : index
    %c0_32 = arith.constant 0 : index
    %c0_33 = arith.constant 0 : index
    %75 = vector.load %arg7[%c0_30, %c0_31, %c0_32, %c0_33] : memref<1x4x8x32xbf16, #tpu.memory_space<vmem>>, vector<1x4x8x32xbf16>
    %76 = vector.shape_cast %75 : vector<1x4x8x32xbf16> to vector<4x8x32xbf16>
    "tpu.trace_start"() <{level = 10 : i32, message = "hsd,hdf->hsf"}> : () -> ()
    %cst_34 = arith.constant dense<0.000000e+00> : vector<4x8x32xf32>
    %77 = tpu.matmul %74, %76, %cst_34 {dimension_numbers = #tpu.dot_dimension_numbers<[2], [1], [1], [2], [0, 0, 0, 1, 1, 2], [0], [0]>} : vector<4x8x8xbf16>, vector<4x8x32xbf16>, vector<4x8x32xf32> -> vector<4x8x32xf32>
    "tpu.trace_stop"() : () -> ()
    %cst_35 = arith.constant dense<0.000000e+00> : vector<8x32xf32>
    %78 = vector.multi_reduction <add>, %77, %cst_35 [0] : vector<4x8x32xf32> to vector<8x32xf32>
    %c0_36 = arith.constant 0 : index
    %c0_37 = arith.constant 0 : index
    %c0_38 = arith.constant 0 : index
    %79 = vector.load %arg11[%c0_36, %c0_37, %c0_38] : memref<1x1x32xf32, #tpu.memory_space<vmem>>, vector<1x1x32xf32>
    %80 = vector.shape_cast %79 : vector<1x1x32xf32> to vector<1x32xf32>
    %81 = vector.broadcast %80 : vector<1x32xf32> to vector<8x32xf32>
    %82 = arith.addf %78, %81 : vector<8x32xf32>
    %83 = arith.truncf %82 : vector<8x32xf32> to vector<8x32xbf16>
    %c0_39 = arith.constant 0 : index
    %c0_40 = arith.constant 0 : index
    %c0_41 = arith.constant 0 : index
    %84 = vector.load %arg12[%c0_39, %c0_40, %c0_41] : memref<1x32x64xbf16, #tpu.memory_space<vmem>>, vector<1x32x64xbf16>
    %85 = vector.shape_cast %84 : vector<1x32x64xbf16> to vector<32x64xbf16>
    %cst_42 = arith.constant dense<0.000000e+00> : vector<8x64xf32>
    %86 = tpu.matmul %83, %85, %cst_42 {dimension_numbers = #tpu.dot_dimension_numbers<[1], [0], [0], [1], [0, 0, 1, 1], [], []>} : vector<8x32xbf16>, vector<32x64xbf16>, vector<8x64xf32> -> vector<8x64xf32>
    %c0_43 = arith.constant 0 : index
    %c0_44 = arith.constant 0 : index
    %c0_45 = arith.constant 0 : index
    %87 = vector.load %arg13[%c0_43, %c0_44, %c0_45] : memref<1x1x64xf32, #tpu.memory_space<vmem>>, vector<1x1x64xf32>
    %88 = vector.shape_cast %87 : vector<1x1x64xf32> to vector<1x64xf32>
    %89 = vector.broadcast %88 : vector<1x64xf32> to vector<8x64xf32>
    %90 = arith.addf %86, %89 : vector<8x64xf32>
    %cst_46 = arith.constant 0.000000e+00 : f32
    %91 = vector.broadcast %cst_46 : f32 to vector<8x64xf32>
    %92 = arith.maximumf %90, %91 : vector<8x64xf32>
    %93 = arith.truncf %92 : vector<8x64xf32> to vector<8x64xbf16>
    %c0_47 = arith.constant 0 : index
    %c0_48 = arith.constant 0 : index
    %c0_49 = arith.constant 0 : index
    %94 = vector.load %arg14[%c0_47, %c0_48, %c0_49] : memref<1x64x32xbf16, #tpu.memory_space<vmem>>, vector<1x64x32xbf16>
    %95 = vector.shape_cast %94 : vector<1x64x32xbf16> to vector<64x32xbf16>
    %cst_50 = arith.constant dense<0.000000e+00> : vector<8x32xf32>
    %96 = tpu.matmul %93, %95, %cst_50 {dimension_numbers = #tpu.dot_dimension_numbers<[1], [0], [0], [1], [0, 0, 1, 1], [], []>} : vector<8x64xbf16>, vector<64x32xbf16>, vector<8x32xf32> -> vector<8x32xf32>
    %c0_51 = arith.constant 0 : index
    %c0_52 = arith.constant 0 : index
    %c0_53 = arith.constant 0 : index
    %97 = vector.load %arg15[%c0_51, %c0_52, %c0_53] : memref<1x1x32xf32, #tpu.memory_space<vmem>>, vector<1x1x32xf32>
    %98 = vector.shape_cast %97 : vector<1x1x32xf32> to vector<1x32xf32>
    %99 = vector.broadcast %98 : vector<1x32xf32> to vector<8x32xf32>
    %100 = arith.addf %96, %99 : vector<8x32xf32>
    %c0_54 = arith.constant 0 : index
    %c0_55 = arith.constant 0 : index
    %101 = vector.load %arg17[%c0_54, %c0_55] : memref<8x32xf32, #tpu.memory_space<vmem>>, vector<8x32xf32>
    tpu.vector_store %arg17[%c0_54, %c0_55], %100 {strides = array<i32>} : memref<8x32xf32, #tpu.memory_space<vmem>>, vector<8x32xf32>,
    %c1_i32 = arith.constant 1 : i32
    %102 = arith.cmpi eq, %arg1, %c1_i32 : i32
    %103 = arith.extui %102 : i1 to i32
    %c0_i32_56 = arith.constant 0 : i32
    %104 = arith.cmpi ne, %103, %c0_i32_56 : i32
    scf.if %104 {
      %c0_57 = arith.constant 0 : index
      %c0_58 = arith.constant 0 : index
      %c0_59 = arith.constant 0 : index
      %105 = vector.load %arg16[%c0_57, %c0_58, %c0_59] : memref<1x8x32xf32, #tpu.memory_space<vmem>>, vector<1x8x32xf32>
      %106 = vector.shape_cast %105 : vector<1x8x32xf32> to vector<8x32xf32>
      %107 = vector.shape_cast %100 : vector<8x32xf32> to vector<1x8x32xf32>
      tpu.vector_store %arg16[%c0_57, %c0_58, %c0_59], %107 {strides = array<i32>} : memref<1x8x32xf32, #tpu.memory_space<vmem>>, vector<1x8x32xf32>,
    } else {
    }
    return
  }
  func.func @transform_0(%arg0: i32, %arg1: i32) -> (i32, i32, i32) {
    %c0_i32 = arith.constant 0 : i32
    %c0_i32_0 = arith.constant 0 : i32
    %c0_i32_1 = arith.constant 0 : i32
    return %arg0, %c0_i32, %c0_i32_0 : i32, i32, i32
  }
  func.func @transform_1(%arg0: i32, %arg1: i32) -> (i32, i32, i32) {
    %c0_i32 = arith.constant 0 : i32
    %c0_i32_0 = arith.constant 0 : i32
    %c0_i32_1 = arith.constant 0 : i32
    return %arg0, %c0_i32, %c0_i32_0 : i32, i32, i32
  }
  func.func @transform_2(%arg0: i32, %arg1: i32) -> (i32, i32, i32) {
    %c0_i32 = arith.constant 0 : i32
    %c0_i32_0 = arith.constant 0 : i32
    %c0_i32_1 = arith.constant 0 : i32
    return %arg1, %c0_i32, %c0_i32_0 : i32, i32, i32
  }
  func.func @transform_3(%arg0: i32, %arg1: i32) -> (i32, i32, i32) {
    %c0_i32 = arith.constant 0 : i32
    %c0_i32_0 = arith.constant 0 : i32
    %c0_i32_1 = arith.constant 0 : i32
    return %arg1, %c0_i32, %c0_i32_0 : i32, i32, i32
  }
  func.func @transform_4(%arg0: i32, %arg1: i32) -> (i32, i32, i32) {
    %c0_i32 = arith.constant 0 : i32
    %c0_i32_0 = arith.constant 0 : i32
    %c0_i32_1 = arith.constant 0 : i32
    return %arg1, %c0_i32, %c0_i32_0 : i32, i32, i32
  }
  func.func @transform_5(%arg0: i32, %arg1: i32) -> (i32, i32, i32, i32) {
    %c0_i32 = arith.constant 0 : i32
    %c0_i32_0 = arith.constant 0 : i32
    %c0_i32_1 = arith.constant 0 : i32
    %c0_i32_2 = arith.constant 0 : i32
    return %arg1, %c0_i32, %c0_i32_0, %c0_i32_1 : i32, i32, i32, i32
  }
  func.func @transform_6(%arg0: i32, %arg1: i32) -> (i32, i32, i32) {
    %c0_i32 = arith.constant 0 : i32
    %c0_i32_0 = arith.constant 0 : i32
    %c0_i32_1 = arith.constant 0 : i32
    return %arg1, %c0_i32, %c0_i32_0 : i32, i32, i32
  }
  func.func @transform_7(%arg0: i32, %arg1: i32) -> (i32, i32, i32) {
    %c0_i32 = arith.constant 0 : i32
    %c0_i32_0 = arith.constant 0 : i32
    %c0_i32_1 = arith.constant 0 : i32
    return %arg1, %c0_i32, %c0_i32_0 : i32, i32, i32
  }
  func.func @transform_8(%arg0: i32, %arg1: i32) -> (i32, i32, i32) {
    %c0_i32 = arith.constant 0 : i32
    %c0_i32_0 = arith.constant 0 : i32
    %c0_i32_1 = arith.constant 0 : i32
    return %arg1, %c0_i32, %c0_i32_0 : i32, i32, i32
  }
  func.func @transform_9(%arg0: i32, %arg1: i32) -> (i32, i32, i32) {
    %c0_i32 = arith.constant 0 : i32
    %c0_i32_0 = arith.constant 0 : i32
    %c0_i32_1 = arith.constant 0 : i32
    return %arg1, %c0_i32, %c0_i32_0 : i32, i32, i32
  }
  func.func @transform_10(%arg0: i32, %arg1: i32) -> (i32, i32, i32) {
    %c0_i32 = arith.constant 0 : i32
    %c0_i32_0 = arith.constant 0 : i32
    %c0_i32_1 = arith.constant 0 : i32
    return %arg1, %c0_i32, %c0_i32_0 : i32, i32, i32
  }
  func.func @transform_11(%arg0: i32, %arg1: i32) -> (i32, i32, i32) {
    %c0_i32 = arith.constant 0 : i32
    %c0_i32_0 = arith.constant 0 : i32
    %c0_i32_1 = arith.constant 0 : i32
    return %arg1, %c0_i32, %c0_i32_0 : i32, i32, i32
  }
  func.func @transform_12(%arg0: i32, %arg1: i32) -> (i32, i32, i32) {
    %c0_i32 = arith.constant 0 : i32
    %c0_i32_0 = arith.constant 0 : i32
    %c0_i32_1 = arith.constant 0 : i32
    return %arg1, %c0_i32, %c0_i32_0 : i32, i32, i32
  }
  func.func @transform_13(%arg0: i32, %arg1: i32) -> (i32, i32, i32) {
    %c0_i32 = arith.constant 0 : i32
    %c0_i32_0 = arith.constant 0 : i32
    %c0_i32_1 = arith.constant 0 : i32
    return %arg1, %c0_i32, %c0_i32_0 : i32, i32, i32
  }
  func.func @transform_14(%arg0: i32, %arg1: i32) -> (i32, i32, i32) {
    %c0_i32 = arith.constant 0 : i32
    %c0_i32_0 = arith.constant 0 : i32
    %c0_i32_1 = arith.constant 0 : i32
    return %arg0, %c0_i32, %c0_i32_0 : i32, i32, i32
  }
}

</mosaic_0001>

<bundles_post_ra>
// kernel: tpu_custom_call.1
= control target key start
LH: loop header
LB: loop body
LE: loop exit
PB: predicated region body
PF: predicated region fallthrough
CT: control target
= control target key end

     0   :  { %s3301_s0 = inlined_call_operand.hbm [shape: f32[2,8,32], index: 0, kind: input, shape index: {}]   ;;  %s3302_s1 = inlined_call_operand.vmem [shape: f32[2,1,8], index: 1, kind: input, shape index: {}]   ;;  %s3303_s2 = inlined_call_operand.vmem [shape: bf16[2,32,32], index: 2, kind: input, shape index: {}]   ;;  %s3304_s3 = inlined_call_operand.vmem [shape: bf16[2,32,32], index: 3, kind: input, shape index: {}]   ;;  %s3305_s4 = inlined_call_operand.vmem [shape: bf16[2,32,32], index: 4, kind: input, shape index: {}]   ;;  %s3306_s5 = inlined_call_operand.hbm [shape: bf16[2,4,8,32], index: 5, kind: input, shape index: {}]   ;;  %s3307_s6 = inlined_call_operand.vmem [shape: f32[2,1,32], index: 6, kind: input, shape index: {}]   ;;  %s3308_s7 = inlined_call_operand.vmem [shape: f32[2,1,32], index: 7, kind: input, shape index: {}]   ;;  %s3309_s8 = inlined_call_operand.vmem [shape: f32[2,1,32], index: 8, kind: input, shape index: {}]   ;;  %s3310_s9 = inlined_call_operand.vmem [shape: f32[2,1,32], index: 9, kind: input, shape index: {}]   ;;  %s3311_s10 = inlined_call_operand.hbm [shape: bf16[2,32,64], index: 10, kind: input, shape index: {}]   ;;  %s3312_s11 = inlined_call_operand.vmem [shape: f32[2,1,64], index: 11, kind: input, shape index: {}]   ;;  %s3313_s12 = inlined_call_operand.vmem [shape: bf16[2,64,32], index: 12, kind: input, shape index: {}]   ;;  %s3314_s13 = inlined_call_operand.vmem [shape: f32[2,1,32], index: 13, kind: input, shape index: {}]   ;;  %s3315_s14 = inlined_call_operand.hbm [shape: f32[2,8,32], index: 14, kind: output, shape index: {}]  }
   0x1   :  { %3342 = sst [smem:[#allocation28_spill]] %s3301_s0 }
   0x2   :  { %3343 = sst [smem:[#allocation29_spill]] %s3302_s1 }
   0x3   :  { %3344 = sst [smem:[#allocation30_spill]] %s3303_s2 }
   0x4   :  { %3345 = sst [smem:[#allocation31_spill]] %s3304_s3 }
   0x5   :  { %3346 = sst [smem:[#allocation32_spill]] %s3305_s4 }
   0x6   :  { %3347 = sst [smem:[#allocation33_spill]] %s3306_s5 }
   0x7   :  { %3348 = sst [smem:[#allocation34_spill]] %s3307_s6 }
   0x8   :  { %3349 = sst [smem:[#allocation35_spill]] %s3308_s7 }
   0x9   :  { %3350 = sst [smem:[#allocation36_spill]] %s3309_s8 }
   0xa   :  { %3351 = sst [smem:[#allocation37_spill]] %s3310_s9 }
   0xb   :  { %3352 = sst [smem:[#allocation38_spill]] %s3311_s10 }
   0xc   :  { %3353 = sst [smem:[#allocation39_spill]] %s3312_s11 }
   0xd   :  { %3354 = sst [smem:[#allocation40_spill]] %s3313_s12 }
   0xe   :  { %3355 = sst [smem:[#allocation41_spill]] %s3314_s13 }
   0xf   :  { %3356 = sst [smem:[#allocation42_spill]] %s3315_s14 }
  0x10   :  { %19 = vsyncpa [#allocation4], 0 }
  0x11   :  { %21 = vsyncpa [#allocation4 + $0x1], 0 }
  0x12   :  { %22 = vsyncpa [#allocation7], 0 }
  0x13   :  { %24 = vsyncpa [#allocation7 + $0x1], 0 }
  0x14   :  { %25 = vsyncpa [#allocation5], 0 }
  0x15   :  { %27 = vsyncpa [#allocation5 + $0x1], 0  ;;  %s2716_s29 = smov 0   ;;  %s2718_s30 = smov 0  }
  0x16   :  { %s2720_s15 = smov 0   ;;  %s2722_s16 = smov 0  }
  0x17   :  { %s2724_s17 = smov 0   ;;  %s2726_s18 = smov 0  }
  0x18   :  { %s2728_s19 = smov 0   ;;  %s2730_s20 = smov 0  }
  0x19   :  { %s2732_s21 = smov 0   ;;  %s2734_s22 = smov 0  }
  0x1a   :  { %s2736_s23 = smov 0  }
  0x1b LB: > { %3357 = sst [smem:[#allocation13_spill]] %s2592_s30  ;;  %s42_s24 = sadd.s32 1, %s2620_s21  ;;  %s2628_s23 = sphi %s2736_s23, %s33_s23   ;;  %s2624_s22 = sphi %s2734_s22, %s3434_s22   ;;  %s2620_s21 = sphi %s2732_s21, %s3433_s21   ;;  %s2616_s20 = sphi %s2730_s20, %s3432_s20   ;;  %s2612_s19 = sphi %s2728_s19, %s3431_s19   ;;  %s2608_s18 = sphi %s2726_s18, %s3430_s18   ;;  %s2604_s17 = sphi %s2724_s17, %s3429_s17   ;;  %s2600_s16 = sphi %s2722_s16, %s3428_s16   ;;  %s2596_s15 = sphi %s2720_s15, %s3427_s15   ;;  %s2592_s30 = sphi %s2718_s30, %s3426_s30   ;;  %s2588_s29 = sphi %s2716_s29, %s3425_s29  }
  0x1c   : > { %3358 = sst [smem:[#allocation14_spill]] %s2596_s15  ;;  %p3321_p0 = scmp.eq.s32.totalorder %s2628_s23, 0 }
  0x1d   : > { %3359 = sst [smem:[#allocation15_spill]] %s2600_s16  ;;  %p2773_p1 = scmp.ge.s32.totalorder %s42_s24, 2 }
  0x1e   : > { %3360 = sst [smem:[#allocation16_spill]] %s2604_s17  ;;  %s182_s26 = sadd.s32 1, %s2596_s15 }
  0x1f   : > { %3361 = sst [smem:[#allocation17_spill]] %s2608_s18  ;;  %p189_p2 = scmp.ne.s32.totalorder %s2596_s15, %s2592_s30 }
  0x20   : > { %3362 = sst [smem:[#allocation18_spill]] %s2616_s20  ;;  %s3436_s24 = smov (%p2773_p1, %s42_s24), 0 }
  0x21   : > { %3363 = sst [smem:[#allocation19_spill]] %s2620_s21  ;;  %p191_p3 = por %p189_p2, %p3321_p0 }
  0x22   : > { %3364 = sst [smem:[#allocation20_spill]] %s2624_s22  ;;  %s179_s27 = ssub.s32 %s2620_s21, %s3436_s24 }
  0x23   : > { %3365 = sst [smem:[#allocation21_spill]] %s2628_s23  ;;  %p3320_p4 = scmp.lt.s32.totalorder %s2628_s23, 4 }
  0x24   : > { %3367 = sst [smem:[#allocation22_spill]] %s3436_s24  ;;  %p180_p5 = scmp.eq.s32.totalorder %s179_s27, 0 }
  0x25   : > { %s501_s28 = sand.u32 1, %s2628_s23   ;;  %s503_s14 = sand.u32 1, %s2596_s15  }
  0x26   : > { %s2792_s13 = scalar_select %p180_p5, %s2596_s15, %s182_s26  }
  0x27   : > { %s2794_s12 = sshll.u32 %s503_s14, 4  ;;  %s3318_s11 = sshll.u32 %s2620_s21, 8 }
  0x28   : > { %3368 = sst [smem:[#allocation23_spill]] %s2792_s13  ;;  %s3369_s5 = sld [smem:[#allocation33_spill]] }
  0x29   : > { %s505_s24 = scalar_lea.vmem [#allocation6], %s2794_s12  ;;  %p2807_p6 = pnand %p3320_p4, %p191_p3 }
  0x2a   : > { %s512_s27 = sshll.u32 %s505_s24, 4  ;;  %s2813_s14 = scalar_lea.sflag [#allocation7], %s501_s28  ;;  %s2811_s27 = int_to_ptr.vmem [resolvable:$true] %s512_s27 }
  0x2b   : > { %p3322_p8 = pneg %p2807_p6 }
  0x2e   : > { %s2802_s7 = scalar_lea.hbm %s3369_s5, %s3318_s11  ;;  %s2417_s11 = scalar_lea.hbm %s3369_s5, 512 }
  0x2f   : > { %s2412_s8 = scalar_lea.hbm %s2802_s7, 256  ;;  %p2418_p11 = scmp.lt.u32.totalorder %s2802_s7, %s3369_s5 }
  0x30   : > { %p2413_p7 = scmp.ne.s32.totalorder %s2802_s7, %s2412_s8  ;;  %p2419_p12 = scmp.lt.u32.totalorder %s2417_s11, %s2412_s8 }
  0x31   : > { %p2421_p2 = scmp.lt.u32.totalorder %s2412_s8, %s2802_s7 }
  0x32   : > { %p2415_p9 = pnand %p3322_p8, %p2413_p7  ;;  %p2420_p13 = por %p2419_p12, %p2418_p11 }
  0x34   : > { %p2416_p10 = pneg %p2415_p9  ;;  %p2422_p3 = por %p2421_p2, %p2420_p13 }
  0x36   : > { %p2423_p5 = pnand %p2422_p3, %p2416_p10 }
  0x38   : > { %2426 = shalt.err (!%p2423_p5)
}
  0x39   : > { %s2427_s28 = scalar_lea.vmem %s2811_s27, 256  ;;  %s2630_s9 = smov [#allocation6]  }
  0x3a   : > { %p2428_p7 = scmp.ne.s32.totalorder %s2811_s27, %s2427_s28  ;;  %s2432_s24 = sshll.u32 %s2630_s9, 4  ;;  %s2433_s24 = int_to_ptr.vmem [resolvable:$false] %s2432_s24 }
  0x3b   : > { %s2434_s13 = scalar_lea.vmem %s2433_s24, 512  ;;  %p2435_p0 = scmp.lt.s32.totalorder %s2811_s27, %s2433_s24 }
  0x3c   : > { %p2430_p9 = pnand %p2428_p7, %p3322_p8  ;;  %p2436_p11 = scmp.lt.s32.totalorder %s2434_s13, %s2427_s28 }
  0x3e   : > { %p2431_p4 = pneg %p2430_p9  ;;  %p2437_p12 = por %p2436_p11, %p2435_p0 }
  0x40   : > { %p2438_p13 = pnand %p2437_p12, %p2431_p4 }
  0x42   : > { %2441 = shalt.err (!%p2438_p13)
}
  0x43   : > { %s3323_s11 = smov 64   ;;  %s3324_s15 = smov 4  }
  0x44   : > { %2279 = dma.hbm_to_vmem [thread:$0]  (!%p2807_p6), %s2802_s7, 256, %s2811_s27, %s2813_s14, %s3323_s11, %s3323_s11, %s3324_s15  }
  0x45   : > { %p195_p0 = scmp.ne.s32.totalorder %s2592_s30, %s2588_s29  ;;  %s3371_s8 = sshll.u32 %s2620_s21, 8 }
  0x46   : > { %s3372_s10 = sld [smem:[#allocation38_spill]]  ;;  %p2047_p4 = scmp.ge.s32.totalorder %s2628_s23, 1 }
  0x47   : > { %s550_s13 = scalar_lea.vmem [#allocation8], %s2794_s12  ;;  %p585_p10 = scmp.lt.s32.totalorder %s2628_s23, 5 }
  0x48   : > { %s557_s5 = sshll.u32 %s550_s13, 4  ;;  %s2861_s7 = sadd.s32 4294967295, %s2628_s23   ;;  %s2928_s5 = int_to_ptr.vmem [resolvable:$true] %s557_s5 }
  0x49   : > { %p2856_p2 = pnand %p2047_p4, %p585_p10  ;;  %s2036_s27 = sadd.s32 4294967294, %s2628_s23  }
  0x4a   : > { %s52_s12 = sadd.s32 1, %s2608_s18  ;;  %p59_p3 = scmp.ne.s32.totalorder %s2608_s18, %s2604_s17 }
  0x4b   : > { %s3373_s4 = scalar_select %p2856_p2, 1, 0 }
  0x4c   : > { %s2851_s24 = scalar_lea.hbm %s3372_s10, %s3371_s8  ;;  %s45_s8 = sadd.s32 1, %s2624_s22 }
  0x4d   : > { %s3438_s8 = smov (!%p2773_p1, %s45_s8), %s2624_s22  ;;  %p65_p7 = scmp.ne.s32.totalorder %s2604_s17, %s2600_s16 }
  0x4e   : > { %p47_p5 = scmp.ge.s32.totalorder %s3438_s8, 2  ;;  %p3374_p9 = scmp.eq.s32.totalorder %s2628_s23, 0 }
  0x4f   : > { %p66_p12 = scmp.eq.s32.totalorder %s2861_s7, 0  ;;  %p427_p4 = scmp.eq.s32.totalorder %s2861_s7, 3 }
  0x50   : > { %p2875_p11 = por %p3374_p9, %p59_p3  ;;  %s3440_s8 = smov (%p47_p5, %s3438_s8), 0 }
  0x51   : > { %3376 = sst [smem:[#allocation24_spill]] %s3440_s8  ;;  %p2885_p1 = por %p66_p12, %p65_p7 }
  0x52   : > { %p2892_p13 = por %p195_p0, %p66_p12  ;;  %s49_s13 = ssub.s32 %s2624_s22, %s3440_s8 }
  0x53   : > { %s3377_s25 = scalar_select %p2885_p1, 1, 0 }
  0x54   : > { %s3378_s9 = scalar_select %p2892_p13, 1, 0 }
  0x55   : > { %p50_p10 = scmp.eq.s32.totalorder %s49_s13, 0  ;;  %p433_p9 = scmp.eq.s32.totalorder %s2036_s27, 3 }
  0x56   : > { %p2899_p8 = por %p427_p4, %p59_p3  ;;  %s453_s15 = sand.u32 1, %s2608_s18  }
  0x57   : > { %s2905_s21 = scalar_select %p50_p10, %s2608_s18, %s52_s12  }
  0x58   : > { %s3379_s11 = scalar_select %p2899_p8, 1, 0 }
  0x59   : > { %3381 = sst [smem:[#allocation26_spill]] %s2905_s21  ;;  %p2910_p5 = por %p433_p9, %p65_p7 }
  0x5a   : > { %3380 = sst [smem:[#allocation25_spill]] %s3379_s11  ;;  %s2039_s29 = sshll.u32 %s453_s15, 3 }
  0x5b   : > { %s3382_s3 = scalar_select %p2910_p5, 1, 0 }
  0x5c   : > { %s2040_s2 = sshll.u32 %s2624_s22, 7  ;;  %s3384_s0 = sld [smem:[#allocation28_spill]] }
  0x5d   : > { %3383 = sst [smem:[#allocation27_spill]] %s3382_s3  ;;  %s457_s27 = scalar_lea.vmem [#allocation3], %s2039_s29 }
  0x5e   : > { %s464_s13 = sshll.u32 %s457_s27, 4  ;;  %p3385_p0 = scmp.lt.s32.totalorder %s2628_s23, 4  ;;  %s2930_s13 = int_to_ptr.vmem [resolvable:$true] %s464_s13 }
  0x5f   : > { %s454_s1 = scalar_lea.sflag [#allocation4], %s453_s15 }
  0x60   : > { %p2924_p3 = pnand %p3385_p0, %p2875_p11 }
  0x62   : > { %s2918_s8 = scalar_lea.hbm %s3384_s0, %s2040_s2  ;;  %p2444_p12 = pneg %p2924_p3 }
  0x63   : > { %s2442_s2 = scalar_lea.hbm %s2918_s8, 128  ;;  %s2447_s29 = scalar_lea.hbm %s3384_s0, 256 }
  0x64   : > { %p2443_p7 = scmp.ne.s32.totalorder %s2918_s8, %s2442_s2  ;;  %p2448_p11 = scmp.lt.u32.totalorder %s2918_s8, %s3384_s0 }
  0x65   : > { %p2449_p9 = scmp.lt.u32.totalorder %s2447_s29, %s2442_s2  ;;  %p2451_p5 = scmp.lt.u32.totalorder %s2442_s2, %s2918_s8 }
  0x66   : > { %p2445_p4 = pnand %p2444_p12, %p2443_p7 }
  0x67   : > { %p2450_p0 = por %p2449_p9, %p2448_p11 }
  0x68   : > { %p2446_p10 = pneg %p2445_p4 }
  0x69   : > { %p2452_p8 = por %p2451_p5, %p2450_p0 }
  0x6b   : > { %p2453_p13 = pnand %p2452_p8, %p2446_p10 }
  0x6d   : > { %2456 = shalt.err (!%p2453_p13)
}
  0x6e   : > { %s2457_s15 = scalar_lea.vmem %s2930_s13, 128  ;;  %s2633_s6 = smov [#allocation3]  }
  0x6f   : > { %p2458_p7 = scmp.ne.s32.totalorder %s2930_s13, %s2457_s15  ;;  %s2462_s28 = sshll.u32 %s2633_s6, 4  ;;  %s2463_s28 = int_to_ptr.vmem [resolvable:$false] %s2462_s28 }
  0x70   : > { %s2464_s22 = scalar_lea.vmem %s2463_s28, 256  ;;  %p2465_p2 = scmp.lt.s32.totalorder %s2930_s13, %s2463_s28 }
  0x71   : > { %p2460_p4 = pnand %p2458_p7, %p2444_p12  ;;  %p2466_p11 = scmp.lt.s32.totalorder %s2464_s22, %s2457_s15 }
  0x73   : > { %p2461_p1 = pneg %p2460_p4  ;;  %p2467_p9 = por %p2466_p11, %p2465_p2 }
  0x75   : > { %p2468_p5 = pnand %p2467_p9, %p2461_p1 }
  0x77   : > { %2471 = shalt.err (!%p2468_p5)
}
  0x78   : > { %2276 = dma.hbm_to_vmem [thread:$0]  (!%p2924_p3), %s2918_s8, 128, %s2930_s13, %s454_s1  }
  0x79   : > { %s2472_s2 = scalar_lea.hbm %s2851_s24, 256  ;;  %p3387_p13 = pneg %p2807_p6 }
  0x7a   : > { %p2473_p8 = scmp.ne.s32.totalorder %s2851_s24, %s2472_s2  ;;  %s2477_s15 = scalar_lea.hbm %s3372_s10, 512 }
  0x7b   : > { %p2478_p2 = scmp.lt.u32.totalorder %s2851_s24, %s3372_s10  ;;  %p2479_p1 = scmp.lt.u32.totalorder %s2477_s15, %s2472_s2 }
  0x7c   : > { %p2475_p12 = pnand %p2473_p8, %p3387_p13  ;;  %p2481_p7 = scmp.lt.u32.totalorder %s2472_s2, %s2851_s24 }
  0x7d   : > { %p2480_p0 = por %p2479_p1, %p2478_p2 }
  0x7e   : > { %p2476_p10 = pneg %p2475_p12 }
  0x7f   : > { %p2482_p4 = por %p2481_p7, %p2480_p0 }
  0x81   : > { %p2483_p11 = pnand %p2482_p4, %p2476_p10 }
  0x83   : > { %2486 = shalt.err (!%p2483_p11)
}
  0x84   : > { %s2487_s8 = scalar_lea.vmem %s2928_s5, 256  ;;  %p3388_p9 = pmov %p3387_p13 }
  0x85   : > { %p2488_p3 = scmp.ne.s32.totalorder %s2928_s5, %s2487_s8  ;;  %s2634_s13 = smov [#allocation8]  }
  0x86   : > { %s2492_s1 = sshll.u32 %s2634_s13, 4  ;;  %s2493_s1 = int_to_ptr.vmem [resolvable:$false] %s2492_s1 }
  0x87   : > { %p2490_p5 = pnand %p2488_p3, %p3388_p9  ;;  %s2494_s28 = scalar_lea.vmem %s2493_s1, 512 }
  0x88   : > { %p2495_p13 = scmp.lt.s32.totalorder %s2928_s5, %s2493_s1  ;;  %p2496_p12 = scmp.lt.s32.totalorder %s2494_s28, %s2487_s8 }
  0x89   : > { %p2491_p8 = pneg %p2490_p5 }
  0x8a   : > { %p2497_p2 = por %p2496_p12, %p2495_p13 }
  0x8c   : > { %p2498_p1 = pnand %p2497_p2, %p2491_p8 }
  0x8e   : > { %2501 = shalt.err (!%p2498_p1)
}
  0x8f   : > { %s3389_s22 = smov 4   ;;  %s3390_s2 = smov 64  }
  0x90   : > { %2282 = dma.hbm_to_vmem [thread:$0]  (!%p2807_p6), %s2851_s24, 256, %s2928_s5, %s2813_s14, %s3390_s2, %s3390_s2, %s3389_s22  }
  0x91   : > { %p3391_p10 = scmp.ne.s32.totalorder %s3373_s4, 0 }
  0x92   : > { %s2987_s29 = sand.u32 (!%p3391_p10), 1, %s2604_s17   ;;  %p3392_p0 = scmp.ne.s32.totalorder (!%p3391_p10), %s3377_s25, 0 }
  0x93   : > { %589 = sbr.rel (%p3391_p10) target bundleno = 1813 (0x715), region = 76  ;;  %s3331_s27 = sshll.u32 (!%p3391_p10), %s2987_s29, 3 }
  0x94   : > { %s592_s15 = scalar_lea.sflag (!%p3391_p10), [#allocation4], %s2987_s29  ;;  %s2993_s26 = scalar_lea.vmem (!%p3391_p10), [#allocation3], %s3331_s27 }
  0x9a   : > { %2575 = dma.done.wait (%p3392_p0), %s592_s15, 128  }
  0x9b   : > { %2577 = vsyncadd (%p3392_p0), %s592_s15, 4294967168  ;;  %s600_s4 = sand.u32 1, %s2861_s7   ;;  %s602_s5 = sand.u32 1, %s2592_s30  }
  0x9c   : > { %s3001_s14 = sshll.u32 %s602_s5, 4  ;;  %s601_s24 = scalar_lea.sflag [#allocation7], %s600_s4 }
  0x9d   : > { %s3004_s6 = scalar_lea.vmem [#allocation6], %s3001_s14  ;;  %p3393_p6 = scmp.ne.s32.totalorder %s3378_s9, 0 }
  0x9f   : > { %2579 = dma.done.wait (%p3393_p6), %s601_s24, 512  }
  0xa0   : > { %2581 = vsyncadd (%p3393_p6), %s601_s24, 4294966784  ;;  %p709_p7 = scmp.lt.s32.totalorder %s2616_s20, 1  ;;  %p712_p4 = scmp.lt.s32.totalorder %s2612_s19, 1 }
  0xa1   : > { %s3396_s24 = sld [smem:[#allocation30_spill]]  ;;  %s3397_s8 = sld [smem:[#allocation31_spill]] }
  0xa2   : > { %s3013_s7 = scalar_select %p709_p7, %s2616_s20, 1 }
  0xa3   : > { %s3016_s25 = scalar_select %p712_p4, %s2612_s19, 1 }
  0xa4   : > { %s3398_s17 = sld [smem:[#allocation32_spill]]  ;;  %s3400_s2 = sld [smem:[#allocation36_spill]] }
  0xa5   : > { %s2104_s1 = sshll.u32 %s3016_s25, 4  ;;  %s2107_s20 = sshll.u32 %s3016_s25, 5 }
  0xa6   : > { %s3403_s21 = sld [smem:[#allocation40_spill]]  ;;  %s3404_s13 = sld [smem:[#allocation41_spill]] }
  0xa7   : > { %s716_s27 = scalar_lea.vmem %s3396_s24, %s2104_s1  ;;  %s3033_s10 = scalar_lea.vmem %s3397_s8, %s2104_s1 }
  0xa8   : > { %s3401_s24 = sld [smem:[#allocation37_spill]]  ;;  %s3402_s8 = sld [smem:[#allocation39_spill]] }
  0xa9   : > { %s613_s28 = scalar_lea.vmem [#allocation8], %s3001_s14  ;;  %s3405_s22 = sshll.u32 %s2987_s29, 3 }
  0xaa   : > { %s3038_s30 = scalar_lea.vmem %s3398_s17, %s2104_s1  ;;  %s735_s15 = scalar_lea.vmem %s3400_s2, %s3016_s25 }
  0xab   : > { %s3069_s2 = scalar_lea.vmem [#allocation9], %s3405_s22  ;;  %p2060_p11 = scmp.ne.s32.totalorder %s2612_s19, 0 }
  0xac   : > { %s3060_s1 = scalar_lea.vmem %s3403_s21, %s2107_s20  ;;  %s749_s16 = scalar_lea.vmem %s3404_s13, %s3016_s25  ;;  %v755_v0 = vld [vmem:[%s2993_s26] sm:$0xff] (!%p2060_p11)  ;;  %vm756_vm0 = vcmask (!%p2060_p11), 261120  }
  0xad   : > { %754 = sbr.rel (%p2060_p11) target bundleno = 180 (0xb4), region = 92  ;;  %757 = vst.msk [vmem:[#allocation2] sm:$0xff] (!%p2060_p11), %vm756_vm0, %v755_v0 }
  0xae   : > { %s738_s23 = scalar_lea.vmem %s3401_s24, %s3016_s25  ;;  %s741_s11 = scalar_lea.vmem %s3402_s8, %s3016_s25 }
  0xb4 PF: > { %v2384_v1 = vld [vmem:[%s716_s27] sm:$0xff]   ;;  %v2635_v2 = vmov 0.0   ;;  %v2385_v3 = vld [vmem:[%s716_s27 + $0x8] sm:$0xff]   ;;  %vm2636_vm1 = vmmov 0   ;;  %vm784_vm2 = vcmask 261120   ;;  %s3406_s27 = sld [smem:[#allocation34_spill]] }
  0xb5   : > { %2149 = vmatprep.subr.bf16.mxu1 %v2635_v2  ;;  %2165 = vmatprep.subr.bf16.mxu0 %v2635_v2  ;;  %v758_v4 = vld [vmem:[#allocation2] sm:$0xff]  ;;  %v2387_v7 = vld [vmem:[%s3033_s10 + $0x8] sm:$0xff]   ;;  %s3408_s24 = sld [smem:[#allocation35_spill]]  ;;  %vm1003_vm3 = vcmask 64512   ;;  %s2638_s12 = smov 104   ;;  %vm1235_vm4 = vcmask 1043456  }
  0xb6   : > { %2150 = vmatpush3.bf16.msra.mxu1 %v2384_v1  ;;  %2153 = vmatprep.mubr.msk.bf16.mxu1 %vm2636_vm1, %v2635_v2  ;;  %v2386_v5 = vld [vmem:[%s3033_s10] sm:$0xff]   ;;  %v760_v6 = vpack.c.bf16 %v758_v4, %v758_v4  ;;  %v2389_v9 = vld [vmem:[%s3038_s30 + $0x8] sm:$0xff]   ;;  %s2639_s8 = smov 112   ;;  %s3411_s3 = sld [smem:[#allocation29_spill]]  ;;  %vm1736_vm5 = vcmask 523264  }
  0xb7   : > { %2151 = vmatprep.subr.bf16.mxu1 %v2635_v2  ;;  %2169 = vmatprep.mubr.msk.bf16.mxu0 %vm2636_vm1, %v2635_v2  ;;  %v2388_v8 = vld [vmem:[%s3038_s30] sm:$0xff]   ;;  %s2637_s30 = smov 120   ;;  %p2097_p3 = scmp.ne.s32.totalorder %s2612_s19, 1 }
  0xb8   : > { %2166 = vmatpush3.bf16.msra.mxu0 %v2388_v8  ;;  %v2069_v26 = vld [vmem:[%s735_s15] ss:$0 sm:$0xff] }
  0xb9   : > { %2167 = vmatprep.subr.bf16.mxu0 %v2635_v2 }
  0xba   : > { %2152 = vmatpush3.bf16.msra.mxu1 %v2385_v3  ;;  %s3407_s26 = scalar_lea.vmem %s3406_s27, %s3016_s25 }
  0xbb   : > { %2157 = vmatprep.subr.bf16.mxu1 %v2635_v2  ;;  %v2061_v10 = vld [vmem:[%s3407_s26] ss:$0 sm:$0xff]  ;;  %s3409_s0 = scalar_lea.vmem %s3408_s24, %s3016_s25 }
  0xbc   : > { %2168 = vmatpush3.bf16.msra.mxu0 %v2389_v9  ;;  %v2065_v17 = vld [vmem:[%s3409_s0] ss:$0 sm:$0xff]  ;;  %s3412_s13 = scalar_lea.vmem %s3411_s3, %s3013_s7 }
  0xbd   : > { %2154 = vmatmul.mubr.msk.bf16.vlgmr.msra.gmra.mrb[0].mxu1 %vm784_vm2, %v760_v6  ;;  %2179 = vmatprep.subr.bf16.mxu0 %v2635_v2  ;;  %v2073_v49 = vld [vmem:[%s3412_s13] ss:$0 sm:$0xff] }
  0xbe   : > { %2158 = vmatpush3.bf16.msra.mxu1 %v2386_v5  ;;  %2161 = vmatprep.mubr.msk.bf16.mxu1 %vm2636_vm1, %v2635_v2 }
  0xbf   : > { %2159 = vmatprep.subr.bf16.mxu1 %v2635_v2  ;;  %2170 = vmatmul.mubr.msk.bf16.vlgmr.msra.gmra.mrb[0].mxu0 %vm784_vm2, %v760_v6 }
  0xc0   : > { %2181 = vmatprep.mubr.msk.bf16.mxu0 %vm2636_vm1, %v2635_v2 }
  0xc2   : > { %2160 = vmatpush3.bf16.msra.mxu1 %v2387_v7 }
  0xc3   : > { %2173 = vmatprep.subr.bf16.mxu1 %v2635_v2 }
  0xc5   : > { %2162 = vmatmul.mubr.msk.bf16.vlgmr.msra.gmra.mrb[4].mxu1 %vm784_vm2, %v760_v6 }
  0xc6   : > { %2175 = vmatprep.mubr.msk.bf16.mxu1 %vm2636_vm1, %v2635_v2 }
 0x190   : > { %v822_v11 = vpop.f32.mrb[0].mxu1 }
 0x191   : > { %v823_v12 = vadd.f32 %v2061_v10, %v822_v11  ;;  %v2155_v13 = vpop.f32.mrb[1].mxu1 }
 0x192   : > { %v825_v14 = vpop.f32.mrb[2].mxu1  ;;  %v948_v27 = vpop.f32.mrb[0].mxu0 }
 0x193   : > { %v954_v15 = vmul.f32 0.35355338, %v823_v12  ;;  %v2156_v16 = vpop.f32.mrb[3].mxu1  ;;  %v3122_v28 = vadd.f32 %v2069_v26, %v948_v27  ;;  %v2171_v29 = vpop.f32.mrb[1].mxu0 }
 0x194   : > { %v951_v30 = vpop.f32.mrb[2].mxu0 }
 0x195   : > { %956 = vrot.lane.b32.xlu1 %v954_v15, %s2637_s30  ;;  %v965_v25 = vpack.c.bf16 %v954_v15, %v954_v15  ;;  %v2172_v31 = vpop.f32.mrb[3].mxu0  ;;  %v993_v42 = vpack.c.bf16 %v3122_v28, %v3122_v28 }
 0x197   : > { %v1237_v46 = vsel %vm1235_vm4, %v993_v42, 0 }
 0x198   : > { %v885_v18 = vpop.f32.mrb[4].mxu1 }
 0x199   : > { %v886_v19 = vadd.f32 %v2065_v17, %v885_v18  ;;  %v2163_v20 = vpop.f32.mrb[5].mxu1 }
 0x19a   : > { %v888_v21 = vpop.f32.mrb[6].mxu1 }
 0x19b   : > { %976 = vrot.lane.b32.xlu1 %v886_v19, %s2638_s12  ;;  %970 = vrot.lane.b32.xlu0 %v886_v19, %s2637_s30  ;;  %v2164_v22 = vpop.f32.mrb[7].mxu1  ;;  %v979_v23 = vpack.c.bf16 %v886_v19, %v886_v19 }
 0x19d   : > { %v1008_v24 = vsel %vm1003_vm3, %v979_v23, 0 }
 0x19e   : > { %2174 = vmatpush3.bf16.xpose.msra.mxu1 %v1008_v24 }
 0x19f   : > { %962 = vrot.lane.b32.xlu1 %v954_v15, %s2638_s12  ;;  %973 = vrot.lane.b32.xlu0 %v886_v19, %s2639_s8 }
 0x1a0   : > { %2185 = vmatprep.subr.bf16.mxu1 %v2635_v2 }
 0x1a3   : > { %959 = vrot.lane.b32.xlu0 %v954_v15, %s2639_s8  ;;  %984 = vrot.lane.b32.xlu1 %v3122_v28, %s2637_s30 }
 0x1a5   : > { %2176 = vmatmul.mubr.msk.bf16.vlgmr.msra.gmra.mrb[8].mxu1 %vm1003_vm3, %v965_v25 }
 0x1a6   : > { %2187 = vmatprep.mubr.msk.bf16.mxu1 %vm2636_vm1, %v2635_v2 }
 0x207   : > { %v957_v32 = vpop.permute.xlu1 %956 }
 0x208   : > { %v966_v41 = vpack.c.bf16 %v957_v32, %v957_v32 }
 0x20d   : > { %v971_v33 = vpop.permute.xlu0 %970  ;;  %v977_v36 = vpop.permute.xlu1 %976 }
 0x20e   : > { %v980_v34 = vpack.c.bf16 %v971_v33, %v971_v33  ;;  %v982_v39 = vpack.c.bf16 %v977_v36, %v977_v36 }
 0x210   : > { %v1054_v35 = vsel %vm1003_vm3, %v980_v34, 0  ;;  %v1146_v44 = vsel %vm1003_vm3, %v982_v39, 0 }
 0x211   : > { %2180 = vmatpush3.bf16.xpose.msra.mxu0 %v1054_v35  ;;  %v974_v37 = vpop.permute.xlu0 %973  ;;  %v963_v47 = vpop.permute.xlu1 %962 }
 0x212   : > { %v981_v38 = vpack.c.bf16 %v974_v37, %v974_v37  ;;  %2191 = vmatprep.subr.bf16.mxu0 %v2635_v2  ;;  %v968_v48 = vpack.c.bf16 %v963_v47, %v963_v47  ;;  %v1425_v37 = vld [vmem:[%s3004_s6] sm:$0xf] }
 0x213   : > { %v1433_v42 = vsel %vm1235_vm4, %v1425_v37, 0 }
 0x214   : > { %v1100_v40 = vsel %vm1003_vm3, %v981_v38, 0 }
 0x215   : > { %2186 = vmatpush3.bf16.xpose.msra.mxu1 %v1100_v40  ;;  %v960_v43 = vpop.permute.xlu0 %959  ;;  %v985_v56 = vpop.permute.xlu1 %984 }
 0x216   : > { %2197 = vmatprep.subr.bf16.mxu1 %v2635_v2  ;;  %v967_v45 = vpack.c.bf16 %v960_v43, %v960_v43  ;;  %v994_v57 = vpack.c.bf16 %v985_v56, %v985_v56 }
 0x218   : > { %2182 = vmatmul.mubr.msk.bf16.vlgmr.msra.gmra.mrb[4].mxu0 %vm1003_vm3, %v966_v41  ;;  %v1283_v58 = vsel %vm1235_vm4, %v994_v57, 0 }
 0x219   : > { %2192 = vmatpush3.bf16.xpose.msra.mxu0 %v1146_v44  ;;  %2193 = vmatprep.mubr.msk.bf16.mxu0 %vm2636_vm1, %v2635_v2 }
 0x21a   : > { %2203 = vmatprep.subr.bf16.mxu0 %v2635_v2 }
 0x21c   : > { %2188 = vmatmul.mubr.msk.bf16.vlgmr.msra.gmra.mrb[12].mxu1 %vm1003_vm3, %v967_v45 }
 0x21d   : > { %2198 = vmatpush3.bf16.msra.mxu1 %v1237_v46  ;;  %2199 = vmatprep.mubr.msk.bf16.mxu1 %vm2636_vm1, %v2635_v2  ;;  %v1426_v46 = vld [vmem:[%s3004_s6 + $0x4] sm:$0xf] }
 0x21e   : > { %2209 = vmatprep.subr.bf16.mxu1 %v2635_v2  ;;  %v1479_v47 = vsel %vm1235_vm4, %v1426_v46, 0 }
 0x220   : > { %2194 = vmatmul.mubr.msk.bf16.vlgmr.msra.gmra.mrb[8].mxu0 %vm1003_vm3, %v968_v48 }
 0x221   : > { %2205 = vmatprep.mubr.msk.bf16.mxu0 %vm2636_vm1, %v2635_v2  ;;  %2204 = vmatpush3.bf16.msra.mxu0 %v1283_v58 }
 0x222   : > { %2215 = vmatprep.subr.bf16.mxu0 %v2635_v2 }
 0x278   : > { %v1044_v50 = vpop.f32.mrb[8].mxu1 }
 0x279   : > { %v1045_v51 = vadd.f32 %v2073_v49, %v1044_v50  ;;  %v2177_v52 = vpop.f32.mrb[9].mxu1 }
 0x27a   : > { %v1047_v53 = vpop.f32.mrb[10].mxu1 }
 0x27b   : > { %v2178_v54 = vpop.f32.mrb[11].mxu1  ;;  %v1188_v55 = vsel %vm1003_vm3, %v1045_v51, -inf }
 0x27c   : > { %1189 = vmax.xlane.f32.xlu0 %v1188_v55 }
 0x2eb   : > { %v1090_v59 = vpop.f32.mrb[4].mxu0 }
 0x2ec   : > { %v1091_v60 = vadd.f32 %v2073_v49, %v1090_v59  ;;  %v2183_v61 = vpop.f32.mrb[5].mxu0 }
 0x2ed   : > { %v1093_v62 = vpop.f32.mrb[6].mxu0 }
 0x2ee   : > { %v2184_v63 = vpop.f32.mrb[7].mxu0  ;;  %v1191_v0 = vsel %vm1003_vm3, %v1091_v60, -inf }
 0x2ef   : > { %1192 = vmax.xlane.f32.xlu1 %v1191_v0  ;;  %v1136_v1 = vpop.f32.mrb[12].mxu1  ;;  %v1428_v63 = vld [vmem:[%s3004_s6 + $0xc] sm:$0xf] }
 0x2f0   : > { %v1137_v3 = vadd.f32 %v2073_v49, %v1136_v1  ;;  %v2189_v4 = vpop.f32.mrb[13].mxu1 }
 0x2f1   : > { %v1139_v5 = vpop.f32.mrb[14].mxu1 }
 0x2f2   : > { %v2190_v6 = vpop.f32.mrb[15].mxu1  ;;  %v1194_v7 = vsel %vm1003_vm3, %v1137_v3, -inf }
 0x2f3   : > { %v1182_v8 = vpop.f32.mrb[8].mxu0  ;;  %1195 = vmax.xlane.f32.xlu0 %v1194_v7  ;;  %v1571_v6 = vsel %vm1235_vm4, %v1428_v63, 0 }
 0x2f4   : > { %v1183_v9 = vadd.f32 %v2073_v49, %v1182_v8  ;;  %v2195_v10 = vpop.f32.mrb[9].mxu0 }
 0x2f5   : > { %v1185_v11 = vpop.f32.mrb[10].mxu0 }
 0x2f6   : > { %v2196_v12 = vpop.f32.mrb[11].mxu0  ;;  %v1197_v13 = vsel %vm1003_vm3, %v1183_v9, -inf }
 0x2f7   : > { %1198 = vmax.xlane.f32.xlu0 %v1197_v13 }
 0x300   : > { %990 = vrot.lane.b32.xlu1 %v3122_v28, %s2638_s12 }
 0x309   : > { %v1190_v14 = vpop.xlane.xlu0 %1189 }
 0x30a   : > { %v1200_v15 = vsub.f32 %v1045_v51, %v1190_v14  ;;  %v1427_v51 = vld [vmem:[%s3004_s6 + $0x8] sm:$0xf] }
 0x30b   : > { %v1525_v57 = vsel %vm1235_vm4, %v1427_v51, 0  ;;  %v2394_v51 = vld [vmem:[%s3060_s1 + $0x10] sm:$0xff]  }
 0x30c   : > { %v1204_v16 = vmul.f32 1.442695, %v1200_v15 }
 0x30d   : > { %987 = vrot.lane.b32.xlu0 %v3122_v28, %s2639_s8 }
 0x30e   : > { %2396 = vpow2.f32 %v1204_v16 }
 0x318   : > { %v2397_v17 = vpop.eup %2396 }
 0x319   : > { %v1228_v18 = vpack.c.bf16 %v2397_v17, %v2397_v17  ;;  %v1212_v19 = vsel %vm1003_vm3, %v2397_v17, 0.0 }
 0x31b   : > { %2200 = vmatmul.mubr.msk.bf16.vlgmr.msra.gmra.mrb[16].mxu1 %vm1003_vm3, %v1228_v18 }
 0x31c   : > { %2211 = vmatprep.mubr.msk.bf16.mxu1 %vm2636_vm1, %v2635_v2 }
 0x324   : > { %1213 = vadd.xlane.f32.xlu1 %v1212_v19 }
 0x37c   : > { %v1193_v20 = vpop.xlane.xlu1 %1192 }
 0x37d   : > { %v1201_v21 = vsub.f32 %v1091_v60, %v1193_v20 }
 0x37f   : > { %v1206_v22 = vmul.f32 1.442695, %v1201_v21  ;;  %v2390_v21 = vld [vmem:[%s613_s28] sm:$0xff]  }
 0x380   : > { %v1196_v23 = vpop.xlane.xlu0 %1195  ;;  %v991_v28 = vpop.permute.xlu1 %990 }
 0x381   : > { %2398 = vpow2.f32 %v1206_v22  ;;  %v1202_v24 = vsub.f32 %v1137_v3, %v1196_v23  ;;  %v996_v32 = vpack.c.bf16 %v991_v28, %v991_v28  ;;  %v2391_v22 = vld [vmem:[%s613_s28 + $0x8] sm:$0xff]   ;;  %v2393_v28 = vld [vmem:[%s3060_s1 + $0x8] sm:$0xff]  }
 0x383   : > { %v1208_v25 = vmul.f32 1.442695, %v1202_v24  ;;  %v1375_v38 = vsel %vm1235_vm4, %v996_v32, 0 }
 0x384   : > { %v1199_v26 = vpop.xlane.xlu0 %1198 }
 0x385   : > { %2400 = vpow2.f32 %v1208_v25  ;;  %v1203_v27 = vsub.f32 %v1183_v9, %v1199_v26 }
 0x387   : > { %v1210_v29 = vmul.f32 1.442695, %v1203_v27  ;;  %v2392_v27 = vld [vmem:[%s3060_s1] sm:$0xff]  }
 0x388   : > { %v988_v30 = vpop.permute.xlu0 %987 }
 0x389   : > { %2402 = vpow2.f32 %v1210_v29  ;;  %v995_v31 = vpack.c.bf16 %v988_v30, %v988_v30 }
 0x38b   : > { %v2399_v33 = vpop.eup %2398  ;;  %v1329_v34 = vsel %vm1235_vm4, %v995_v31, 0 }
 0x38c   : > { %2210 = vmatpush3.bf16.msra.mxu1 %v1329_v34  ;;  %v1215_v35 = vsel %vm1003_vm3, %v2399_v33, 0.0  ;;  %v1229_v36 = vpack.c.bf16 %v2399_v33, %v2399_v33 }
 0x38d   : > { %1216 = vadd.xlane.f32.xlu0 %v1215_v35  ;;  %2221 = vmatprep.subr.bf16.mxu1 %v2635_v2 }
 0x38e   : > { %2206 = vmatmul.mubr.msk.bf16.vlgmr.msra.gmra.mrb[12].mxu0 %vm1003_vm3, %v1229_v36 }
 0x38f   : > { %v2401_v39 = vpop.eup %2400  ;;  %2216 = vmatpush3.bf16.msra.mxu0 %v1375_v38  ;;  %2217 = vmatprep.mubr.msk.bf16.mxu0 %vm2636_vm1, %v2635_v2 }
 0x390   : > { %v1218_v40 = vsel %vm1003_vm3, %v2401_v39, 0.0  ;;  %v1230_v41 = vpack.c.bf16 %v2401_v39, %v2401_v39  ;;  %2227 = vmatprep.subr.bf16.mxu0 %v2635_v2 }
 0x391   : > { %1219 = vadd.xlane.f32.xlu0 %v1218_v40 }
 0x392   : > { %2212 = vmatmul.mubr.msk.bf16.vlgmr.msra.gmra.mrb[20].mxu1 %vm1003_vm3, %v1230_v41 }
 0x393   : > { %v2403_v43 = vpop.eup %2402  ;;  %2222 = vmatpush3.bf16.msra.mxu1 %v1433_v42  ;;  %2223 = vmatprep.mubr.msk.bf16.mxu1 %vm2636_vm1, %v2635_v2 }
 0x394   : > { %v1221_v44 = vsel %vm1003_vm3, %v2403_v43, 0.0  ;;  %v1231_v45 = vpack.c.bf16 %v2403_v43, %v2403_v43  ;;  %2233 = vmatprep.subr.bf16.mxu1 %v2635_v2 }
 0x395   : > { %1222 = vadd.xlane.f32.xlu1 %v1221_v44  ;;  %v2086_v44 = vld [vmem:[%s738_s23] ss:$0 sm:$0xff] }
 0x396   : > { %2218 = vmatmul.mubr.msk.bf16.vlgmr.msra.gmra.mrb[16].mxu0 %vm1003_vm3, %v1231_v45 }
 0x397   : > { %2229 = vmatprep.mubr.msk.bf16.mxu0 %vm2636_vm1, %v2635_v2  ;;  %2228 = vmatpush3.bf16.msra.mxu0 %v1479_v47 }
 0x398   : > { %2239 = vmatprep.subr.bf16.mxu0 %v2635_v2 }
 0x3b1   : > { %v1214_v48 = vpop.xlane.xlu1 %1213 }
 0x3b2   : > { %2404 = vrcp.f32 %v1214_v48 }
 0x3bc   : > { %v2405_v49 = vpop.eup %2404 }
 0x3ee   : > { %v1273_v50 = vpop.f32.mrb[16].mxu1 }
 0x3ef   : > { %v1417_v52 = vmul.f32 %v2405_v49, %v1273_v50  ;;  %v2201_v53 = vpop.f32.mrb[17].mxu1 }
 0x3f0   : > { %v1276_v54 = vpop.f32.mrb[18].mxu1  ;;  %v2087_v53 = vld [vmem:[%s741_s11] ss:$0 sm:$0xff] }
 0x3f1   : > { %v1421_v55 = vpack.c.bf16 %v1417_v52, %v1417_v52  ;;  %v2202_v56 = vpop.f32.mrb[19].mxu1  ;;  %v2395_v52 = vld [vmem:[%s3060_s1 + $0x18] sm:$0xff]  }
 0x3f3   : > { %2224 = vmatmul.mubr.msk.bf16.vlgmr.msra.gmra.mrb[24].mxu1 %vm1003_vm3, %v1421_v55 }
 0x3f4   : > { %2234 = vmatpush3.bf16.msra.mxu1 %v1525_v57  ;;  %2235 = vmatprep.mubr.msk.bf16.mxu1 %vm2636_vm1, %v2635_v2 }
 0x3f5   : > { %2245 = vmatprep.subr.bf16.mxu1 %v2635_v2 }
 0x41a   : > { %v1217_v58 = vpop.xlane.xlu0 %1216 }
 0x41b   : > { %2406 = vrcp.f32 %v1217_v58 }
 0x41e   : > { %v1220_v59 = vpop.xlane.xlu0 %1219 }
 0x41f   : > { %2408 = vrcp.f32 %v1220_v59 }
 0x422   : > { %v1223_v60 = vpop.xlane.xlu1 %1222 }
 0x423   : > { %2410 = vrcp.f32 %v1223_v60 }
 0x425   : > { %v2407_v61 = vpop.eup %2406 }
 0x429   : > { %v2409_v7 = vpop.eup %2408 }
 0x42d   : > { %v2411_v14 = vpop.eup %2410 }
 0x461   : > { %v1319_v62 = vpop.f32.mrb[12].mxu0 }
 0x462   : > { %v1418_v0 = vmul.f32 %v2407_v61, %v1319_v62  ;;  %v2207_v1 = vpop.f32.mrb[13].mxu0 }
 0x463   : > { %v1322_v3 = vpop.f32.mrb[14].mxu0 }
 0x464   : > { %v1422_v4 = vpack.c.bf16 %v1418_v0, %v1418_v0  ;;  %v2208_v5 = vpop.f32.mrb[15].mxu0 }
 0x465   : > { %v1365_v8 = vpop.f32.mrb[20].mxu1 }
 0x466   : > { %v1419_v9 = vmul.f32 %v2409_v7, %v1365_v8  ;;  %v2213_v10 = vpop.f32.mrb[21].mxu1  ;;  %2230 = vmatmul.mubr.msk.bf16.vlgmr.msra.gmra.mrb[20].mxu0 %vm1003_vm3, %v1422_v4 }
 0x467   : > { %v1368_v11 = vpop.f32.mrb[22].mxu1  ;;  %2240 = vmatpush3.bf16.msra.mxu0 %v1571_v6  ;;  %2241 = vmatprep.mubr.msk.bf16.mxu0 %vm2636_vm1, %v2635_v2 }
 0x468   : > { %v1423_v12 = vpack.c.bf16 %v1419_v9, %v1419_v9  ;;  %v2214_v13 = vpop.f32.mrb[23].mxu1  ;;  %2253 = vmatprep.subr.bf16.mxu0 %v2635_v2 }
 0x469   : > { %v1411_v15 = vpop.f32.mrb[16].mxu0 }
 0x46a   : > { %v1420_v16 = vmul.f32 %v2411_v14, %v1411_v15  ;;  %v2219_v17 = vpop.f32.mrb[17].mxu0  ;;  %2236 = vmatmul.mubr.msk.bf16.vlgmr.msra.gmra.mrb[28].mxu1 %vm1003_vm3, %v1423_v12 }
 0x46b   : > { %v1414_v18 = vpop.f32.mrb[18].mxu0  ;;  %2249 = vmatprep.mubr.msk.bf16.mxu1 %vm2636_vm1, %v2635_v2  ;;  %2246 = vmatpush3.bf16.msra.mxu1 %v2390_v21 }
 0x46c   : > { %v1424_v19 = vpack.c.bf16 %v1420_v16, %v1420_v16  ;;  %v2220_v20 = vpop.f32.mrb[19].mxu0  ;;  %2247 = vmatprep.subr.bf16.mxu1 %v2635_v2 }
 0x46e   : > { %2242 = vmatmul.mubr.msk.bf16.vlgmr.msra.gmra.mrb[24].mxu0 %vm1003_vm3, %v1424_v19 }
 0x46f   : > { %2261 = vmatprep.mubr.msk.bf16.mxu0 %vm2636_vm1, %v2635_v2  ;;  %2248 = vmatpush3.bf16.msra.mxu1 %v2391_v22 }
 0x470   : > { %2254 = vmatpush3.bf16.msra.mxu0 %v2392_v27 }
 0x471   : > { %2255 = vmatprep.subr.bf16.mxu0 %v2635_v2 }
 0x474   : > { %2256 = vmatpush3.bf16.msra.mxu0 %v2393_v28 }
 0x475   : > { %2257 = vmatprep.subr.bf16.mxu0 %v2635_v2 }
 0x478   : > { %2258 = vmatpush3.bf16.msra.mxu0 %v2394_v51 }
 0x479   : > { %2259 = vmatprep.subr.bf16.mxu0 %v2635_v2  ;;  %v2091_v2 = vld [vmem:[%s749_s16] ss:$0 sm:$0xff] }
 0x47c   : > { %2260 = vmatpush3.bf16.msra.mxu0 %v2395_v52 }
 0x4c6   : > { %v1469_v23 = vpop.f32.mrb[24].mxu1 }
 0x4c7   : > { %v2225_v24 = vpop.f32.mrb[25].mxu1  ;;  %v1613_v30 = vsel %vm784_vm2, %v1469_v23, 0.0 }
 0x4c8   : > { %v1472_v25 = vpop.f32.mrb[26].mxu1 }
 0x4c9   : > { %v2226_v26 = vpop.f32.mrb[27].mxu1 }
 0x539   : > { %v1515_v29 = vpop.f32.mrb[20].mxu0 }
 0x53a   : > { %v1614_v31 = vsel %vm784_vm2, %v1515_v29, 0.0  ;;  %v2231_v32 = vpop.f32.mrb[21].mxu0 }
 0x53b   : > { %v1615_v33 = vadd.f32 %v1614_v31, %v1613_v30  ;;  %v1518_v34 = vpop.f32.mrb[22].mxu0 }
 0x53c   : > { %v2232_v35 = vpop.f32.mrb[23].mxu0 }
 0x53d   : > { %v1561_v36 = vpop.f32.mrb[28].mxu1 }
 0x53e   : > { %v1616_v37 = vsel %vm784_vm2, %v1561_v36, 0.0  ;;  %v2237_v38 = vpop.f32.mrb[29].mxu1 }
 0x53f   : > { %v1617_v39 = vadd.f32 %v1616_v37, %v1615_v33  ;;  %v1564_v40 = vpop.f32.mrb[30].mxu1 }
 0x540   : > { %v2238_v41 = vpop.f32.mrb[31].mxu1 }
 0x541   : > { %v1607_v42 = vpop.f32.mrb[24].mxu0 }
 0x542   : > { %v1618_v43 = vsel %vm784_vm2, %v1607_v42, 0.0  ;;  %v2243_v45 = vpop.f32.mrb[25].mxu0 }
 0x543   : > { %v1619_v46 = vadd.f32 %v1618_v43, %v1617_v39  ;;  %v1610_v47 = vpop.f32.mrb[26].mxu0 }
 0x544   : > { %v2244_v48 = vpop.f32.mrb[27].mxu0 }
 0x545   : > { %v1627_v49 = vadd.f32 %v2086_v44, %v1619_v46 }
 0x547   : > { %v1628_v50 = vpack.c.bf16 %v1627_v49, %v1627_v49 }
 0x549   : > { %2250 = vmatmul.mubr.msk.bf16.vlgmr.msra.gmra.mrb[32].mxu1 %vm784_vm2, %v1628_v50 }
 0x61c   : > { %v1689_v54 = vpop.f32.mrb[32].mxu1 }
 0x61d   : > { %v1690_v55 = vadd.f32 %v2087_v53, %v1689_v54  ;;  %v2251_v56 = vpop.f32.mrb[33].mxu1 }
 0x61e   : > { %v1692_v57 = vpop.f32.mrb[34].mxu1 }
 0x61f   : > { %v1695_v58 = vmax.f32 %v1690_v55, 0.0  ;;  %v2252_v59 = vpop.f32.mrb[35].mxu1 }
 0x621   : > { %v1696_v60 = vpack.c.bf16 %v1695_v58, %v1695_v58 }
 0x623   : > { %2262 = vmatmul.mubr.msk.bf16.vlgmr.msra.gmra.mrb[28].mxu0 %vm1736_vm5, %v1696_v60 }
 0x6f3   : > { %1784 = sbr.rel (%p2097_p3) target bundleno = 1786 (0x6fa), region = 96 }
 0x6f6   : > { %v1774_v61 = vpop.f32.mrb[28].mxu0 }
 0x6f7   : > { %v1775_v62 = vadd.f32 %v2091_v2, %v1774_v61  ;;  %v2263_v63 = vpop.f32.mrb[29].mxu0 }
 0x6f8   : > { %v1777_v0 = vpop.f32.mrb[30].mxu0 }
 0x6f9   : > { %1780 = vst.msk [vmem:[#allocation2] sm:$0xff] %vm784_vm2, %v1775_v62  ;;  %v2264_v1 = vpop.f32.mrb[31].mxu0  ;;  %1785 = vst.msk [vmem:[%s3069_s2] sm:$0xff] (!%p2097_p3), %vm784_vm2, %v1775_v62 }
 0x6fa PF: > { %s3416_s11 = sld [smem:[#allocation18_spill]]  ;;  %s3417_s1 = sld [smem:[#allocation25_spill]] }
 0x6fb   : > { %s3418_s30 = sld [smem:[#allocation42_spill]]  ;;  %s1800_s24 = sshll.u32 %s3069_s2, 4  ;;  %s1801_s24 = int_to_ptr.vmem [resolvable:$true] %s1800_s24 }
 0x6fc   : > { %s1787_s0 = scalar_lea.sflag [#allocation5], %s2987_s29  ;;  %s2502_s12 = scalar_lea.vmem %s1801_s24, 128 }
 0x6fd   : > { %p2503_p9 = scmp.ne.s32.totalorder %s1801_s24, %s2502_s12  ;;  %s2640_s19 = smov [#allocation9]  }
 0x6fe   : > { %s2506_s8 = sshll.u32 %s2640_s19, 4  ;;  %s2507_s8 = int_to_ptr.vmem [resolvable:$false] %s2506_s8 }
 0x6ff   : > { %s2508_s18 = scalar_lea.vmem %s2507_s8, 256  ;;  %p2509_p12 = scmp.lt.s32.totalorder %s1801_s24, %s2507_s8 }
 0x700   : > { %s2099_s25 = sshll.u32 %s3416_s11, 7  ;;  %p3420_p5 = scmp.ne.s32.totalorder %s3417_s1, 0 }
 0x701   : > { %s3419_s4 = smov %s3418_s30  ;;  %s3243_s5 = scalar_lea.hbm %s3418_s30, %s2099_s25 }
 0x702   : > { %p2504_p8 = pnand %p2503_p9, %p3420_p5  ;;  %p2510_p2 = scmp.lt.s32.totalorder %s2508_s18, %s2502_s12 }
 0x704   : > { %p2505_p13 = pneg %p2504_p8  ;;  %p2511_p1 = por %p2510_p2, %p2509_p12 }
 0x706   : > { %p2512_p10 = pnand %p2511_p1, %p2505_p13 }
 0x708   : > { %2515 = shalt.err (!%p2512_p10)
}
 0x709   : > { %s2516_s29 = scalar_lea.hbm %s3243_s5, 128  ;;  %s2520_s21 = scalar_lea.hbm %s3419_s4, 256 }
 0x70a   : > { %p2517_p0 = scmp.ne.s32.totalorder %s3243_s5, %s2516_s29  ;;  %p2521_p4 = scmp.lt.u32.totalorder %s3243_s5, %s3419_s4 }
 0x70b   : > { %p2522_p11 = scmp.lt.u32.totalorder %s2520_s21, %s2516_s29  ;;  %p2524_p9 = scmp.lt.u32.totalorder %s2516_s29, %s3243_s5 }
 0x70c   : > { %p2518_p6 = pnand %p2517_p0, %p3420_p5 }
 0x70d   : > { %p2523_p3 = por %p2522_p11, %p2521_p4 }
 0x70e   : > { %p2519_p7 = pneg %p2518_p6 }
 0x70f   : > { %p2525_p8 = por %p2524_p9, %p2523_p3 }
 0x711   : > { %p2526_p13 = pnand %p2525_p8, %p2519_p7 }
 0x713   : > { %2529 = shalt.err (!%p2526_p13)
}
 0x714   : > { %2271 = dma.vmem_to_hbm [thread:$0]  (%p3420_p5), %s1801_s24, 128, %s3243_s5, %s1787_s0  }
 0x715 PF: > { %s3421_s3 = sld [smem:[#allocation21_spill]]  ;;  %s3422_s13 = sld [smem:[#allocation15_spill]] }
 0x716   : > { %s3423_s14 = sld [smem:[#allocation27_spill]] }
 0x71b   : > { %p2288_p12 = scmp.ge.s32.totalorder %s3421_s3, 2  ;;  %s1812_s6 = sand.u32 1, %s3422_s13  }
 0x71c   : > { %p3424_p2 = scmp.ne.s32.totalorder %s3423_s14, 0  ;;  %s1813_s7 = scalar_lea.sflag [#allocation5], %s1812_s6 }
 0x71e   : > { %p2284_p1 = pnand %p2288_p12, %p3424_p2 }
 0x720   : > { %2583 = dma.done.wait (!%p2284_p1), %s1813_s7, 128  }
 0x721   : > { %2585 = vsyncadd (!%p2284_p1), %s1813_s7, 4294967168  ;;  %s33_s23 = sadd.s32 1, %s3421_s3   ;;  %s3425_s29 = sld [smem:[#allocation13_spill]] }
 0x722   : > { %p30_p10 = scmp.ge.s32.totalorder %s33_s23, 6   ;;  %s3426_s30 = sld [smem:[#allocation14_spill]] }
 0x723   : > { %s3427_s15 = sld [smem:[#allocation23_spill]]  ;;  %s3428_s16 = sld [smem:[#allocation16_spill]] }
 0x724   : > { %s3429_s17 = sld [smem:[#allocation17_spill]]  ;;  %s3430_s18 = sld [smem:[#allocation26_spill]] }
 0x725   : > { %s3431_s19 = sld [smem:[#allocation19_spill]]  ;;  %s3432_s20 = sld [smem:[#allocation20_spill]] }
 0x726   : > { %s3433_s21 = sld [smem:[#allocation22_spill]]  ;;  %s3434_s22 = sld [smem:[#allocation24_spill]] }
 0x727   :  { %32 = sbr.rel (!%p30_p10) target bundleno = 27 (0x1b), region = 186 }
 0x72e   :  { %1818 = vsyncpa [#allocation4], 1 }
 0x72f   :  { %1820 = vsyncpa [#allocation4 + $0x1], 1 }
 0x730   :  { %1821 = vsyncpa [#allocation7], 1 }
 0x731   :  { %1823 = vsyncpa [#allocation7 + $0x1], 1 }
 0x732   :  { %1824 = vsyncpa [#allocation5], 1 }
 0x733   :  { %1826 = vsyncpa [#allocation5 + $0x1], 1 }

</bundles_post_ra>
